<compile_context>
chip_gen: v7x
topology: tpu7x:2x2x1
jax: 0.10.0
libtpu: 0.0.40
codegen_flags: <defaults>
</compile_context>

<pallas_src>
import functools

import jax
import jax.numpy as jnp
from jax import lax
from jax.experimental import pallas as pl
from jax.experimental.pallas import tpu as pltpu


def _conv_std_kernel(x_ref, w_ref, feat_ref, xpad_ref):
    """Per-batch-tile: 3x3 same-conv (no bias) + per-channel unbiased spatial std.

    x_ref   : (TB, H, W, Cin)    bf16  NHWC feature tile
    w_ref   : (9*Cin, Cout)      bf16  conv weights, tap-major (kh, kw, cin) rows
    feat_ref: (TB, 1, Cout)      f32   output std features
    xpad_ref: (TB, H+2, W, Cin)  f32   scratch, H-halo padded (leading-dim pad only)
    """
    TB, H, W, Cin = x_ref.shape
    Cout = feat_ref.shape[-1]
    R = TB * H

    # Stage the tile with a zero H-halo. All stores are leading-dim slices (no relayout).
    xpad_ref[:, pl.ds(0, 1)] = jnp.zeros((TB, 1, W, Cin), jnp.float32)
    xpad_ref[:, pl.ds(H + 1, 1)] = jnp.zeros((TB, 1, W, Cin), jnp.float32)
    xpad_ref[:, pl.ds(1, H)] = x_ref[...].astype(jnp.float32)

    # Build the im2col block (R*W, 9*Cin). ky shifts are free leading-dim slices of the
    # padded scratch; kx = +/-1 shifts use pltpu.roll on the sublane (W) axis + a mask,
    # so no sublane-unaligned slices are ever taken.
    w_idx = lax.broadcasted_iota(jnp.int32, (R, W, Cin), 1)
    left_ok = w_idx > 0            # valid columns for the (w-1) tap
    right_ok = w_idx < (W - 1)     # valid columns for the (w+1) tap

    taps = []
    for ky in range(3):  # input row offset ky-1, handled by the padded scratch
        band = xpad_ref[:, pl.ds(ky, H)].reshape(R, W, Cin)
        tap_m1 = jnp.where(left_ok, pltpu.roll(band, shift=1, axis=1), 0.0)       # w-1
        tap_p1 = jnp.where(right_ok, pltpu.roll(band, shift=W - 1, axis=1), 0.0)  # w+1
        taps += [tap_m1.astype(jnp.bfloat16),
                 band.astype(jnp.bfloat16),
                 tap_p1.astype(jnp.bfloat16)]
    patches = jnp.concatenate(taps, axis=-1).reshape(R * W, 9 * Cin)

    # Single K = 9*Cin MXU matmul with f32 accumulation.
    h = jnp.dot(patches, w_ref[...], preferred_element_type=jnp.float32)  # (R*W, Cout)
    h = h.reshape(TB, H * W, Cout)

    # Unbiased std over the spatial axis (two-pass, f32) -- fused, h never leaves VMEM.
    n = H * W
    mu = jnp.mean(h, axis=1, keepdims=True)
    var = jnp.sum((h - mu) ** 2, axis=1) / (n - 1)
    feat_ref[...] = jnp.sqrt(var).reshape(TB, 1, Cout)


def _predsim_loss_kernel(feat_ref, yoh_ref, loss_ref):
    """(B, C) std features + (B, K) one-hot labels -> scalar PredSim MSE loss."""

    def sim_matrix(x):                                   # x: (B, D) f32
        xc = x - jnp.mean(x, axis=1, keepdims=True)
        norm = jnp.sqrt(jnp.sum(xc * xc, axis=1, keepdims=True))
        xn = xc / (1e-8 + norm)
        r = lax.dot_general(xn, xn, (((1,), (1,)), ((), ())),
                            preferred_element_type=jnp.float32)
        return jnp.clip(r, -1.0, 1.0)

    rh = sim_matrix(feat_ref[...].astype(jnp.float32))
    ry = sim_matrix(yoh_ref[...].astype(jnp.float32))
    loss = jnp.mean((rh - ry) ** 2)
    loss_ref[...] = jnp.full((1, 1), loss, jnp.float32)


def _pick_batch_tile(batch, max_tile=4):
    """Largest divisor of `batch` <= max_tile that still leaves >= 2 grid steps."""
    best = 1
    for t in range(1, min(batch, max_tile) + 1):
        if batch % t == 0 and batch // t >= 2:
            best = t
    return best


@functools.partial(jax.jit, static_argnames=("class_num",))
def decoder_predsim(features_nchw, y, weight, class_num):
    """features_nchw: (B, Cin, H, W) f32; y: (B,) int labels;
    weight: (Cout, Cin, 3, 3) f32 Conv2d weight (bias=False). Returns scalar loss."""
    B, Cin, H, W = features_nchw.shape
    Cout = weight.shape[0]
    TB = _pick_batch_tile(B)

    # Layout glue (fused by XLA into one producer): NCHW -> NHWC + bf16 cast. No jnp.pad --
    # the conv halo is handled inside the kernel.
    x_nhwc = jnp.transpose(features_nchw, (0, 2, 3, 1)).astype(jnp.bfloat16)   # (B,H,W,Cin)
    w_mat = jnp.transpose(weight, (2, 3, 1, 0)).reshape(9 * Cin, Cout)
    w_mat = w_mat.astype(jnp.bfloat16)                                         # (9*Cin,Cout)
    y_onehot = jax.nn.one_hot(y, class_num, dtype=jnp.float32)                 # (B, K)

    # ---- Phase 1: conv + per-sample spatial std, gridded over the batch ---------------
    conv_flops = 2 * B * H * W * (9 * Cin) * Cout + 6 * B * H * W * Cout
    conv_bytes = x_nhwc.size * 2 + w_mat.size * 2 + B * Cout * 4
    feat = pl.pallas_call(
        _conv_std_kernel,
        out_shape=jax.ShapeDtypeStruct((B, 1, Cout), jnp.float32),
        grid_spec=pltpu.PrefetchScalarGridSpec(
            num_scalar_prefetch=0,
            grid=(B // TB,),
            in_specs=[
                pl.BlockSpec((TB, H, W, Cin), lambda b: (b, 0, 0, 0)),
                pl.BlockSpec((9 * Cin, Cout), lambda b: (0, 0)),   # weights stay resident
            ],
            out_specs=pl.BlockSpec((TB, 1, Cout), lambda b: (b, 0, 0)),
            scratch_shapes=[pltpu.VMEM((TB, H + 2, W, Cin), jnp.float32)],
        ),
        compiler_params=pltpu.CompilerParams(
            dimension_semantics=("parallel",),          # megacore split on v7x
            vmem_limit_bytes=32 * 1024 * 1024,
        ),
        cost_estimate=pl.CostEstimate(
            flops=conv_flops, transcendentals=B * Cout, bytes_accessed=conv_bytes),
    )(x_nhwc, w_mat)
    feat = feat.reshape(B, Cout)

    # ---- Phase 2: tiny (B, B) similarity-matrix + MSE epilogue ------------------------
    loss = pl.pallas_call(
        _predsim_loss_kernel,
        out_shape=jax.ShapeDtypeStruct((1, 1), jnp.float32),
        in_specs=[
            pl.BlockSpec(memory_space=pltpu.MemorySpace.VMEM),
            pl.BlockSpec(memory_space=pltpu.MemorySpace.VMEM),
        ],
        out_specs=pl.BlockSpec(memory_space=pltpu.MemorySpace.VMEM),
    )(feat, y_onehot)
    return loss[0, 0]


if __name__ == "__main__":
    key = jax.random.PRNGKey(0)
    B, C, H, W, K = 2, 4, 16, 16, 10          # batch, inplanes, spatial, class_num
    k1, k2, k3 = jax.random.split(key, 3)

    features = jax.random.normal(k1, (B, C, H, W), dtype=jnp.float32)
    y = jax.random.randint(k2, (B,), 0, K)

    # Deterministic Conv2d(inplanes, inplanes, 3, bias=False) weight init
    # (kaiming-uniform-style bound, as in PyTorch's default).
    fan_in = C * 3 * 3
    bound = 1.0 / (fan_in ** 0.5)
    conv_w = jax.random.uniform(k3, (C, C, 3, 3), jnp.float32, -bound, bound)

    loss = decoder_predsim(features, y, conv_w, K)
    jax.block_until_ready(loss)
    print("KERNEL_OK")
</pallas_src>

<mosaic_0001>
module attributes {stable_mosaic.version = 11 : i64} {
  func.func @_predsim_loss_kernel(%arg0: memref<2x4xf32, #tpu.memory_space<vmem>>, %arg1: memref<2x10xf32, #tpu.memory_space<vmem>>, %arg2: memref<1x1xf32, #tpu.memory_space<vmem>>) attributes {dimension_semantics = [], scalar_prefetch = 0 : i64, scratch_operands = 0 : i64, tpu.core_type = #tpu.core_type<tc>} {
    %c0 = arith.constant 0 : index
    %c0_0 = arith.constant 0 : index
    %0 = vector.load %arg0[%c0, %c0_0] : memref<2x4xf32, #tpu.memory_space<vmem>>, vector<2x4xf32>
    %cst = arith.constant dense<0.000000e+00> : vector<2xf32>
    %1 = vector.multi_reduction <add>, %0, %cst [1] : vector<2x4xf32> to vector<2xf32>
    %2 = vector.shape_cast %1 : vector<2xf32> to vector<2x1xf32>
    %cst_1 = arith.constant 4.000000e+00 : f32
    %3 = vector.broadcast %cst_1 : f32 to vector<2x1xf32>
    %4 = arith.divf %2, %3 : vector<2x1xf32>
    %5 = vector.broadcast %4 : vector<2x1xf32> to vector<2x4xf32>
    %6 = arith.subf %0, %5 : vector<2x4xf32>
    %7 = arith.mulf %6, %6 : vector<2x4xf32>
    %cst_2 = arith.constant dense<0.000000e+00> : vector<2xf32>
    %8 = vector.multi_reduction <add>, %7, %cst_2 [1] : vector<2x4xf32> to vector<2xf32>
    %9 = vector.shape_cast %8 : vector<2xf32> to vector<2x1xf32>
    %10 = math.sqrt %9 : vector<2x1xf32>
    %cst_3 = arith.constant 9.99999993E-9 : f32
    %11 = vector.broadcast %cst_3 : f32 to vector<2x1xf32>
    %12 = arith.addf %11, %10 : vector<2x1xf32>
    %13 = vector.broadcast %12 : vector<2x1xf32> to vector<2x4xf32>
    %14 = arith.divf %6, %13 : vector<2x4xf32>
    %cst_4 = arith.constant dense<0.000000e+00> : vector<2x2xf32>
    %15 = tpu.matmul %14, %14, %cst_4 {dimension_numbers = #tpu.dot_dimension_numbers<[1], [1], [0], [0], [0, 0, 1, 0], [], []>} : vector<2x4xf32>, vector<2x4xf32>, vector<2x2xf32> -> vector<2x2xf32>
    %cst_5 = arith.constant -1.000000e+00 : f32
    %cst_6 = arith.constant 1.000000e+00 : f32
    %16 = vector.broadcast %cst_5 : f32 to vector<2x2xf32>
    %17 = arith.maximumf %16, %15 : vector<2x2xf32>
    %18 = vector.broadcast %cst_6 : f32 to vector<2x2xf32>
    %19 = arith.minimumf %18, %17 : vector<2x2xf32>
    %c0_7 = arith.constant 0 : index
    %c0_8 = arith.constant 0 : index
    %20 = vector.load %arg1[%c0_7, %c0_8] : memref<2x10xf32, #tpu.memory_space<vmem>>, vector<2x10xf32>
    %cst_9 = arith.constant dense<0.000000e+00> : vector<2xf32>
    %21 = vector.multi_reduction <add>, %20, %cst_9 [1] : vector<2x10xf32> to vector<2xf32>
    %22 = vector.shape_cast %21 : vector<2xf32> to vector<2x1xf32>
    %cst_10 = arith.constant 1.000000e+01 : f32
    %23 = vector.broadcast %cst_10 : f32 to vector<2x1xf32>
    %24 = arith.divf %22, %23 : vector<2x1xf32>
    %25 = vector.broadcast %24 : vector<2x1xf32> to vector<2x10xf32>
    %26 = arith.subf %20, %25 : vector<2x10xf32>
    %27 = arith.mulf %26, %26 : vector<2x10xf32>
    %cst_11 = arith.constant dense<0.000000e+00> : vector<2xf32>
    %28 = vector.multi_reduction <add>, %27, %cst_11 [1] : vector<2x10xf32> to vector<2xf32>
    %29 = vector.shape_cast %28 : vector<2xf32> to vector<2x1xf32>
    %30 = math.sqrt %29 : vector<2x1xf32>
    %cst_12 = arith.constant 9.99999993E-9 : f32
    %31 = vector.broadcast %cst_12 : f32 to vector<2x1xf32>
    %32 = arith.addf %31, %30 : vector<2x1xf32>
    %33 = vector.broadcast %32 : vector<2x1xf32> to vector<2x10xf32>
    %34 = arith.divf %26, %33 : vector<2x10xf32>
    %cst_13 = arith.constant dense<0.000000e+00> : vector<2x2xf32>
    %35 = tpu.matmul %34, %34, %cst_13 {dimension_numbers = #tpu.dot_dimension_numbers<[1], [1], [0], [0], [0, 0, 1, 0], [], []>} : vector<2x10xf32>, vector<2x10xf32>, vector<2x2xf32> -> vector<2x2xf32>
    %cst_14 = arith.constant -1.000000e+00 : f32
    %cst_15 = arith.constant 1.000000e+00 : f32
    %36 = vector.broadcast %cst_14 : f32 to vector<2x2xf32>
    %37 = arith.maximumf %36, %35 : vector<2x2xf32>
    %38 = vector.broadcast %cst_15 : f32 to vector<2x2xf32>
    %39 = arith.minimumf %38, %37 : vector<2x2xf32>
    %40 = arith.subf %19, %39 : vector<2x2xf32>
    %41 = arith.mulf %40, %40 : vector<2x2xf32>
    %42 = vector.shape_cast %41 : vector<2x2xf32> to vector<1x2x2xf32>
    %cst_16 = arith.constant dense<0.000000e+00> : vector<1xf32>
    %43 = vector.multi_reduction <add>, %42, %cst_16 [1, 2] : vector<1x2x2xf32> to vector<1xf32>
    %44 = vector.shape_cast %43 : vector<1xf32> to vector<1x1x1xf32>
    %45 = vector.extract %44[0, 0, 0] : f32 from vector<1x1x1xf32>
    %cst_17 = arith.constant 4.000000e+00 : f32
    %46 = arith.divf %45, %cst_17 : f32
    %47 = vector.broadcast %46 : f32 to vector<1x1xf32>
    %c0_18 = arith.constant 0 : index
    %c0_19 = arith.constant 0 : index
    %48 = vector.load %arg2[%c0_18, %c0_19] : memref<1x1xf32, #tpu.memory_space<vmem>>, vector<1x1xf32>
    tpu.vector_store %arg2[%c0_18, %c0_19], %47 {strides = array<i32>} : memref<1x1xf32, #tpu.memory_space<vmem>>, vector<1x1xf32>,
    return
  }
}

module attributes {stable_mosaic.version = 11 : i64} {
  func.func @_conv_std_kernel(%arg0: i32, %arg1: memref<1x16x16x4xbf16, #tpu.memory_space<vmem>>, %arg2: memref<36x4xbf16, #tpu.memory_space<vmem>>, %arg3: memref<1x1x4xf32, #tpu.memory_space<vmem>>, %arg4: memref<1x18x16x4xf32, #tpu.memory_space<vmem>>) attributes {dimension_semantics = [#tpu.dimension_semantics<parallel>], iteration_bounds = array<i64: 2>, scalar_prefetch = 0 : i64, scratch_operands = 1 : i64, tpu.core_type = #tpu.core_type<tc>, window_params = [{transform_indices = @transform_0, window_bounds = array<i64: 1, 16, 16, 4>}, {pipeline_mode = #tpu.pipeline_mode<synchronous>, transform_indices = @transform_1, window_bounds = array<i64: 36, 4>}, {transform_indices = @transform_2, window_bounds = array<i64: 1, 1, 4>}]} {
    %cst = arith.constant 0.000000e+00 : f32
    %0 = vector.broadcast %cst : f32 to vector<1x1x16x4xf32>
    %c0 = arith.constant 0 : index
    %c0_0 = arith.constant 0 : index
    %c0_1 = arith.constant 0 : index
    %c0_2 = arith.constant 0 : index
    %1 = vector.load %arg4[%c0, %c0_0, %c0_1, %c0_2] : memref<1x18x16x4xf32, #tpu.memory_space<vmem>>, vector<1x1x16x4xf32>
    tpu.vector_store %arg4[%c0, %c0_0, %c0_1, %c0_2], %0 {strides = array<i32>} : memref<1x18x16x4xf32, #tpu.memory_space<vmem>>, vector<1x1x16x4xf32>,
    %cst_3 = arith.constant 0.000000e+00 : f32
    %2 = vector.broadcast %cst_3 : f32 to vector<1x1x16x4xf32>
    %c0_4 = arith.constant 0 : index
    %c17 = arith.constant 17 : index
    %c0_5 = arith.constant 0 : index
    %c0_6 = arith.constant 0 : index
    %3 = vector.load %arg4[%c0_4, %c17, %c0_5, %c0_6] : memref<1x18x16x4xf32, #tpu.memory_space<vmem>>, vector<1x1x16x4xf32>
    tpu.vector_store %arg4[%c0_4, %c17, %c0_5, %c0_6], %2 {strides = array<i32>} : memref<1x18x16x4xf32, #tpu.memory_space<vmem>>, vector<1x1x16x4xf32>,
    %c0_7 = arith.constant 0 : index
    %c0_8 = arith.constant 0 : index
    %c0_9 = arith.constant 0 : index
    %c0_10 = arith.constant 0 : index
    %4 = vector.load %arg1[%c0_7, %c0_8, %c0_9, %c0_10] : memref<1x16x16x4xbf16, #tpu.memory_space<vmem>>, vector<1x16x16x4xbf16>
    %5 = arith.extf %4 : vector<1x16x16x4xbf16> to vector<1x16x16x4xf32>
    %c0_11 = arith.constant 0 : index
    %c1 = arith.constant 1 : index
    %c0_12 = arith.constant 0 : index
    %c0_13 = arith.constant 0 : index
    %6 = vector.load %arg4[%c0_11, %c1, %c0_12, %c0_13] : memref<1x18x16x4xf32, #tpu.memory_space<vmem>>, vector<1x16x16x4xf32>
    tpu.vector_store %arg4[%c0_11, %c1, %c0_12, %c0_13], %5 {strides = array<i32>} : memref<1x18x16x4xf32, #tpu.memory_space<vmem>>, vector<1x16x16x4xf32>,
    %7 = tpu.iota {dimensions = array<i32: 1>} : vector<16x16x4xi32>
    %c0_i32 = arith.constant 0 : i32
    %8 = vector.broadcast %c0_i32 : i32 to vector<16x16x4xi32>
    %9 = arith.cmpi sgt, %7, %8 : vector<16x16x4xi32>
    %c15_i32 = arith.constant 15 : i32
    %10 = vector.broadcast %c15_i32 : i32 to vector<16x16x4xi32>
    %11 = arith.cmpi slt, %7, %10 : vector<16x16x4xi32>
    %c0_14 = arith.constant 0 : index
    %c0_15 = arith.constant 0 : index
    %c0_16 = arith.constant 0 : index
    %c0_17 = arith.constant 0 : index
    %12 = vector.load %arg4[%c0_14, %c0_15, %c0_16, %c0_17] : memref<1x18x16x4xf32, #tpu.memory_space<vmem>>, vector<1x16x16x4xf32>
    %13 = vector.shape_cast %12 : vector<1x16x16x4xf32> to vector<16x16x4xf32>
    %c1_i32 = arith.constant 1 : i32
    %14 = tpu.dynamic_rotate %13 by %c1_i32 dim 1 : vector<16x16x4xf32>, i32 -> vector<16x16x4xf32>
    %cst_18 = arith.constant 0.000000e+00 : f32
    %15 = vector.broadcast %cst_18 : f32 to vector<16x16x4xf32>
    %16 = arith.select %9, %14, %15 : vector<16x16x4xi1>, vector<16x16x4xf32>
    %c15_i32_19 = arith.constant 15 : i32
    %17 = tpu.dynamic_rotate %13 by %c15_i32_19 dim 1 : vector<16x16x4xf32>, i32 -> vector<16x16x4xf32>
    %cst_20 = arith.constant 0.000000e+00 : f32
    %18 = vector.broadcast %cst_20 : f32 to vector<16x16x4xf32>
    %19 = arith.select %11, %17, %18 : vector<16x16x4xi1>, vector<16x16x4xf32>
    %20 = arith.truncf %16 : vector<16x16x4xf32> to vector<16x16x4xbf16>
    %21 = arith.truncf %13 : vector<16x16x4xf32> to vector<16x16x4xbf16>
    %22 = arith.truncf %19 : vector<16x16x4xf32> to vector<16x16x4xbf16>
    %c0_21 = arith.constant 0 : index
    %c1_22 = arith.constant 1 : index
    %c0_23 = arith.constant 0 : index
    %c0_24 = arith.constant 0 : index
    %23 = vector.load %arg4[%c0_21, %c1_22, %c0_23, %c0_24] : memref<1x18x16x4xf32, #tpu.memory_space<vmem>>, vector<1x16x16x4xf32>
    %24 = vector.shape_cast %23 : vector<1x16x16x4xf32> to vector<16x16x4xf32>
    %c1_i32_25 = arith.constant 1 : i32
    %25 = tpu.dynamic_rotate %24 by %c1_i32_25 dim 1 : vector<16x16x4xf32>, i32 -> vector<16x16x4xf32>
    %cst_26 = arith.constant 0.000000e+00 : f32
    %26 = vector.broadcast %cst_26 : f32 to vector<16x16x4xf32>
    %27 = arith.select %9, %25, %26 : vector<16x16x4xi1>, vector<16x16x4xf32>
    %c15_i32_27 = arith.constant 15 : i32
    %28 = tpu.dynamic_rotate %24 by %c15_i32_27 dim 1 : vector<16x16x4xf32>, i32 -> vector<16x16x4xf32>
    %cst_28 = arith.constant 0.000000e+00 : f32
    %29 = vector.broadcast %cst_28 : f32 to vector<16x16x4xf32>
    %30 = arith.select %11, %28, %29 : vector<16x16x4xi1>, vector<16x16x4xf32>
    %31 = arith.truncf %27 : vector<16x16x4xf32> to vector<16x16x4xbf16>
    %32 = arith.truncf %24 : vector<16x16x4xf32> to vector<16x16x4xbf16>
    %33 = arith.truncf %30 : vector<16x16x4xf32> to vector<16x16x4xbf16>
    %c0_29 = arith.constant 0 : index
    %c2 = arith.constant 2 : index
    %c0_30 = arith.constant 0 : index
    %c0_31 = arith.constant 0 : index
    %34 = vector.load %arg4[%c0_29, %c2, %c0_30, %c0_31] : memref<1x18x16x4xf32, #tpu.memory_space<vmem>>, vector<1x16x16x4xf32>
    %35 = vector.shape_cast %34 : vector<1x16x16x4xf32> to vector<16x16x4xf32>
    %c1_i32_32 = arith.constant 1 : i32
    %36 = tpu.dynamic_rotate %35 by %c1_i32_32 dim 1 : vector<16x16x4xf32>, i32 -> vector<16x16x4xf32>
    %cst_33 = arith.constant 0.000000e+00 : f32
    %37 = vector.broadcast %cst_33 : f32 to vector<16x16x4xf32>
    %38 = arith.select %9, %36, %37 : vector<16x16x4xi1>, vector<16x16x4xf32>
    %c15_i32_34 = arith.constant 15 : i32
    %39 = tpu.dynamic_rotate %35 by %c15_i32_34 dim 1 : vector<16x16x4xf32>, i32 -> vector<16x16x4xf32>
    %cst_35 = arith.constant 0.000000e+00 : f32
    %40 = vector.broadcast %cst_35 : f32 to vector<16x16x4xf32>
    %41 = arith.select %11, %39, %40 : vector<16x16x4xi1>, vector<16x16x4xf32>
    %42 = arith.truncf %38 : vector<16x16x4xf32> to vector<16x16x4xbf16>
    %43 = arith.truncf %35 : vector<16x16x4xf32> to vector<16x16x4xbf16>
    %44 = arith.truncf %41 : vector<16x16x4xf32> to vector<16x16x4xbf16>
    %45 = tpu.concatenate %20, %21, %22, %31, %32, %33, %42, %43, %44 in 2 : vector<16x16x4xbf16>, vector<16x16x4xbf16>, vector<16x16x4xbf16>, vector<16x16x4xbf16>, vector<16x16x4xbf16>, vector<16x16x4xbf16>, vector<16x16x4xbf16>, vector<16x16x4xbf16>, vector<16x16x4xbf16> -> vector<16x16x36xbf16>
    %46 = vector.shape_cast %45 : vector<16x16x36xbf16> to vector<256x36xbf16>
    %c0_36 = arith.constant 0 : index
    %c0_37 = arith.constant 0 : index
    %47 = vector.load %arg2[%c0_36, %c0_37] : memref<36x4xbf16, #tpu.memory_space<vmem>>, vector<36x4xbf16>
    %cst_38 = arith.constant dense<0.000000e+00> : vector<256x4xf32>
    %48 = tpu.matmul %46, %47, %cst_38 {dimension_numbers = #tpu.dot_dimension_numbers<[1], [0], [0], [1], [0, 0, 1, 1], [], []>} : vector<256x36xbf16>, vector<36x4xbf16>, vector<256x4xf32> -> vector<256x4xf32>
    %49 = vector.shape_cast %48 : vector<256x4xf32> to vector<1x256x4xf32>
    %cst_39 = arith.constant dense<0.000000e+00> : vector<1x4xf32>
    %50 = vector.multi_reduction <add>, %49, %cst_39 [1] : vector<1x256x4xf32> to vector<1x4xf32>
    %51 = vector.shape_cast %50 : vector<1x4xf32> to vector<1x1x4xf32>
    %cst_40 = arith.constant 2.560000e+02 : f32
    %52 = vector.broadcast %cst_40 : f32 to vector<1x1x4xf32>
    %53 = arith.divf %51, %52 : vector<1x1x4xf32>
    %54 = vector.broadcast %53 : vector<1x1x4xf32> to vector<1x256x4xf32>
    %55 = arith.subf %49, %54 : vector<1x256x4xf32>
    %56 = arith.mulf %55, %55 : vector<1x256x4xf32>
    %cst_41 = arith.constant dense<0.000000e+00> : vector<1x4xf32>
    %57 = vector.multi_reduction <add>, %56, %cst_41 [1] : vector<1x256x4xf32> to vector<1x4xf32>
    %cst_42 = arith.constant 2.550000e+02 : f32
    %58 = vector.broadcast %cst_42 : f32 to vector<1x4xf32>
    %59 = arith.divf %57, %58 : vector<1x4xf32>
    %60 = math.sqrt %59 : vector<1x4xf32>
    %61 = vector.shape_cast %60 : vector<1x4xf32> to vector<1x1x4xf32>
    %c0_43 = arith.constant 0 : index
    %c0_44 = arith.constant 0 : index
    %c0_45 = arith.constant 0 : index
    %62 = vector.load %arg3[%c0_43, %c0_44, %c0_45] : memref<1x1x4xf32, #tpu.memory_space<vmem>>, vector<1x1x4xf32>
    tpu.vector_store %arg3[%c0_43, %c0_44, %c0_45], %61 {strides = array<i32>} : memref<1x1x4xf32, #tpu.memory_space<vmem>>, vector<1x1x4xf32>,
    return
  }
  func.func @transform_0(%arg0: i32) -> (i32, i32, i32, i32) {
    %c0_i32 = arith.constant 0 : i32
    %c0_i32_0 = arith.constant 0 : i32
    %c0_i32_1 = arith.constant 0 : i32
    %c0_i32_2 = arith.constant 0 : i32
    return %arg0, %c0_i32, %c0_i32_0, %c0_i32_1 : i32, i32, i32, i32
  }
  func.func @transform_1(%arg0: i32) -> (i32, i32) {
    %c0_i32 = arith.constant 0 : i32
    %c0_i32_0 = arith.constant 0 : i32
    %c0_i32_1 = arith.constant 0 : i32
    return %c0_i32, %c0_i32_0 : i32, i32
  }
  func.func @transform_2(%arg0: i32) -> (i32, i32, i32) {
    %c0_i32 = arith.constant 0 : i32
    %c0_i32_0 = arith.constant 0 : i32
    %c0_i32_1 = arith.constant 0 : i32
    return %arg0, %c0_i32, %c0_i32_0 : i32, i32, i32
  }
}

</mosaic_0001>

<bundles_post_ra>
// kernel: decoder_predsim.3
= control target key start
LH: loop header
LB: loop body
LE: loop exit
PB: predicated region body
PF: predicated region fallthrough
CT: control target
= control target key end

     0   :  { %vm13_vm0 = vcmask 25600   ;;  %vm111_vm1 = vcmask 74752   ;;  %s336_s0 = inlined_call_operand.vmem [shape: f32[2,4], index: 0, kind: input, shape index: {}]   ;;  %s337_s1 = inlined_call_operand.vmem [shape: f32[2,10], index: 1, kind: input, shape index: {}]   ;;  %s338_s2 = inlined_call_operand.hbm [shape: f32[1,1], index: 2, kind: output, shape index: {}]  }
   0x1   :  { %v12_v0 = vld [vmem:[%s336_s0] sm:$0x3] }
   0x2   :  { %v110_v1 = vld [vmem:[%s337_s1] sm:$0x3]  ;;  %v14_v2 = vsel %vm13_vm0, %v12_v0, 0.0 }
   0x3   :  { %7 = vsyncpa [#allocation3], 0  ;;  %15 = vadd.xlane.f32.xlu0 %v14_v2  ;;  %v112_v3 = vsel %vm111_vm1, %v110_v1, 0.0  ;;  %v298_v14 = vmov 0.0   ;;  %vm299_vm2 = vmmov 0   ;;  %vm34_vm7 = vcmask 31744  }
   0x4   :  { %251 = vmatprep.subr.mxu0 %v298_v14  ;;  %256 = vmatprep.subr.mxu1 %v298_v14  ;;  %vm132_vm8 = vcmask 80896   ;;  %vm210_vm9 = vcmask 9216   ;;  %s300_s0 = smov [#allocation2]   ;;  %vm225_vm10 = vcmask 0  }
   0x5   :  { %253 = vmatprep.mubr.msk.f32.mxu0 %vm299_vm2, %v298_v14  ;;  %258 = vmatprep.mubr.msk.f32.mxu1 %vm299_vm2, %v298_v14  ;;  %s233_s1 = sshll.u32 %s300_s0, 4  ;;  %s234_s1 = int_to_ptr.vmem [resolvable:$true] %s233_s1 }
   0x6   :  { %s274_s15 = scalar_lea.vmem %s234_s1, 16  ;;  %s278_s16 = scalar_lea.vmem %s234_s1, 32 }
   0x7   :  { %113 = vadd.xlane.f32.xlu0 %v112_v3  ;;  %p275_p0 = scmp.ne.s32.totalorder %s234_s1, %s274_s15  ;;  %p279_p1 = scmp.lt.s32.totalorder %s234_s1, %s234_s1 }
   0x8   :  { %p280_p2 = scmp.lt.s32.totalorder %s278_s16, %s274_s15 }
   0xa   :  { %p281_p3 = por %p280_p2, %p279_p1 }
   0xc   :  { %p282_p4 = pnand %p281_p3, %p275_p0 }
  0x90   :  { %v16_v4 = vpop.xlane.xlu0 %15 }
  0x91   :  { %v18_v5 = vmul.f32 0.25, %v16_v4 }
  0x93   :  { %v19_v6 = vsub.f32 %v12_v0, %v18_v5 }
  0x94   :  { %v114_v7 = vpop.xlane.xlu0 %113 }
  0x95   :  { %v116_v8 = vmul.f32 0.1, %v114_v7  ;;  %v20_v9 = vmul.f32 %v19_v6, %v19_v6 }
  0x97   :  { %v117_v10 = vsub.f32 %v110_v1, %v116_v8  ;;  %v21_v11 = vsel %vm13_vm0, %v20_v9, 0.0 }
  0x98   :  { %22 = vadd.xlane.f32.xlu1 %v21_v11 }
  0x99   :  { %v118_v12 = vmul.f32 %v117_v10, %v117_v10 }
  0x9b   :  { %v119_v13 = vsel %vm111_vm1, %v118_v12, 0.0 }
  0x9c   :  { %120 = vadd.xlane.f32.xlu1 %v119_v13 }
 0x125   :  { %v23_v15 = vpop.xlane.xlu1 %22 }
 0x126   :  { %266 = vrsqrt.f32 %v23_v15  ;;  %vm26_vm3 = vcmp.eq.f32.partialorder %v23_v15, inf  ;;  %v29_v19 = vand.u32 2147483648, %v23_v15  ;;  %vm28_vm4 = vcmp.eq.f32.partialorder %v23_v15, 0.0 }
 0x129   :  { %v121_v16 = vpop.xlane.xlu1 %120 }
 0x12a   :  { %268 = vrsqrt.f32 %v121_v16  ;;  %vm124_vm5 = vcmp.eq.f32.partialorder %v121_v16, inf  ;;  %v127_v25 = vand.u32 2147483648, %v121_v16  ;;  %vm126_vm6 = vcmp.eq.f32.partialorder %v121_v16, 0.0 }
 0x130   :  { %v267_v17 = vpop.eup %266 }
 0x131   :  { %v25_v18 = vmul.f32 %v267_v17, %v23_v15 }
 0x133   :  { %v27_v20 = vsel %vm26_vm3, %v23_v15, %v25_v18 }
 0x134   :  { %v269_v21 = vpop.eup %268  ;;  %v30_v22 = vsel %vm28_vm4, %v29_v19, %v27_v20 }
 0x135   :  { %v31_v23 = vadd.f32 1e-08, %v30_v22  ;;  %v123_v24 = vmul.f32 %v269_v21, %v121_v16 }
 0x137   :  { %270 = vrcp.f32 %v31_v23  ;;  %v125_v26 = vsel %vm124_vm5, %v121_v16, %v123_v24 }
 0x138   :  { %v128_v27 = vsel %vm126_vm6, %v127_v25, %v125_v26 }
 0x139   :  { %v129_v28 = vadd.f32 1e-08, %v128_v27 }
 0x13b   :  { %272 = vrcp.f32 %v129_v28 }
 0x141   :  { %v271_v29 = vpop.eup %270 }
 0x142   :  { %v33_v30 = vmul.f32 %v271_v29, %v19_v6 }
 0x144   :  { %252 = vmatpush3.xpose.msk.msra.mxu0 %vm34_vm7, %v33_v30 }
 0x145   :  { %v273_v31 = vpop.eup %272 }
 0x146   :  { %v131_v32 = vmul.f32 %v273_v31, %v117_v10 }
 0x147   :  { %254 = vmatmul.mubr.msk.f32.vlgmr.msra.gmra.mrb[0].mxu0 %vm34_vm7, %v33_v30 }
 0x148   :  { %257 = vmatpush3.xpose.msk.msra.mxu1 %vm132_vm8, %v131_v32 }
 0x14b   :  { %259 = vmatmul.mubr.msk.f32.vlgmr.msra.gmra.mrb[0].mxu1 %vm132_vm8, %v131_v32 }
 0x21a   :  { %v104_v33 = vpop.f32.mrb[0].mxu0 }
 0x21b   :  { %v255_v34 = vpop.f32.mrb[1].mxu0  ;;  %v243_v36 = vclamps-f32 %v104_v33, 1.0 }
 0x21e   :  { %v202_v35 = vpop.f32.mrb[0].mxu1 }
 0x21f   :  { %v246_v37 = vclamps-f32 %v202_v35, 1.0  ;;  %v260_v38 = vpop.f32.mrb[1].mxu1 }
 0x221   :  { %v208_v39 = vsub.f32 %v243_v36, %v246_v37 }
 0x223   :  { %v209_v40 = vmul.f32 %v208_v39, %v208_v39 }
 0x225   :  { %v211_v41 = vsel %vm210_vm9, %v209_v40, 0.0 }
 0x226   :  { %212 = vadd.xlane.f32.xlu0 %v211_v41 }
 0x2b3   :  { %v213_v42 = vpop.xlane.xlu0 %212 }
 0x2b4   :  { %v214_v43 = vrot.slane %v213_v42, 4 }
 0x2b6   :  { %v215_v44 = vadd.f32 %v214_v43, %v213_v42 }
 0x2b8   :  { %v216_v45 = vrot.slane %v215_v44, 2 }
 0x2ba   :  { %v217_v46 = vadd.f32 %v216_v45, %v215_v44 }
 0x2bc   :  { %v218_v47 = vrot.slane %v217_v46, 1 }
 0x2be   :  { %v219_v48 = vadd.f32 %v218_v47, %v217_v46 }
 0x2c0   :  { %261 = vpush %v219_v48 }
 0x2f1   :  { %s262_s13 = spop %261 }
 0x2f2   :  { %s223_s14 = smul.f32 0.25, %s262_s13 }
 0x2f4   :  { %v224_v49 = vstv %s223_s14 }
 0x2f5   :  { %226 = vst.msk [vmem:[#allocation2] sm:$0x1] %vm225_vm10, %v224_v49 }
 0x2f6   :  { %285 = shalt.err (!%p282_p4)
}
 0x2f7   :  { %s286_s19 = scalar_lea.hbm %s338_s2, 16 }
 0x2f8   :  { %p287_p5 = scmp.ne.s32.totalorder %s338_s2, %s286_s19  ;;  %p290_p6 = scmp.lt.u32.totalorder %s286_s19, %s338_s2 }
 0x2fa   :  { %p292_p7 = pnand %p290_p6, %p287_p5 }
 0x2fc   :  { %295 = shalt.err (!%p292_p7)
}
 0x2fd   :  { %236 = dma.vmem_to_hbm [thread:$0]  %s234_s1, 16, %s338_s2, [#allocation3]  }
 0x2fe   :  { %296 = dma.done.wait [#allocation3], 16  }
 0x2ff   :  { %297 = vsyncadd [#allocation3], 4294967280 }
 0x300   :  { %240 = vsyncpa [#allocation3], 1 }

// kernel: decoder_predsim.2
= control target key start
LH: loop header
LB: loop body
LE: loop exit
PB: predicated region body
PF: predicated region fallthrough
CT: control target
= control target key end

     0   :  { %s2440_s9 = smov 0   ;;  %s3330_s0 = inlined_call_operand.vmem [shape: bf16[2,16,16,4], index: 0, kind: input, shape index: {}]   ;;  %s3331_s1 = inlined_call_operand.vmem [shape: bf16[36,4], index: 1, kind: input, shape index: {}]   ;;  %s3332_s2 = inlined_call_operand.vmem [shape: f32[2,1,4], index: 2, kind: output, shape index: {}]  }
   0x1 LB: > { %s2213_s10 = sadd.s32 4294967295, %s2414_s9   ;;  %p2217_p0 = scmp.ge.s32.totalorder %s2414_s9, 1  ;;  %s2414_s9 = sphi %s2440_s9, %s12_s9  }
   0x2   : > { %p112_p1 = scmp.lt.s32.totalorder %s2414_s9, 3 }
   0x4   : > { %p113_p2 = pnand %p2217_p0, %p112_p1 }
   0x5   : > { %vm141_vm0 = vcmask (!%p113_p2), 31744   ;;  %v244_v0 = vlaneseq (!%p113_p2)  ;;  %v2416_v1 = vmov (!%p113_p2), 0.0   ;;  %p132_p3 = scmp.lt.s32.totalorder (!%p113_p2), %s2213_s10, 1  ;;  %s2417_s15 = smov (!%p113_p2), 4   ;;  %vm1786_vm5 = vcmask (!%p113_p2), 1041408  }
   0x6   : > { %116 = sbr.rel (%p113_p2) target bundleno = 734 (0x2de), region = 28  ;;  %142 = vst.msk [vmem:[#allocation2] sm:$0xff] (!%p113_p2), %vm141_vm0, %v2416_v1  ;;  %143 = vst.msk [vmem:[#allocation2 + $0x8] sm:$0xff] (!%p113_p2), %vm141_vm0, %v2416_v1  ;;  %s2418_s16 = smov (!%p113_p2), 8   ;;  %vm1502_vm6 = vcmask (!%p113_p2), 64512   ;;  %vm1535_vm7 = vcmask (!%p113_p2), 97280  }
   0x7   : > { %145 = vst.msk [vmem:[#allocation2 + $0x110] sm:$0xff] (!%p113_p2), %vm141_vm0, %v2416_v1  ;;  %146 = vst.msk [vmem:[#allocation2 + $0x118] sm:$0xff] (!%p113_p2), %vm141_vm0, %v2416_v1  ;;  %v2452_v2 = vshrl.u32 (!%p113_p2), %v244_v0, 7  ;;  %s2419_s17 = smov (!%p113_p2), 16   ;;  %s2420_s22 = smov (!%p113_p2), 12   ;;  %vm1568_vm8 = vcmask (!%p113_p2), 130048  }
   0x8   : > { %s2421_s23 = smov (!%p113_p2), 20   ;;  %s2422_s24 = smov (!%p113_p2), 24   ;;  %vm1601_vm9 = vcmask (!%p113_p2), 162816   ;;  %vm1634_vm10 = vcmask (!%p113_p2), 195584   ;;  %vm1667_vm11 = vcmask (!%p113_p2), 228352   ;;  %vm1700_vm12 = vcmask (!%p113_p2), 261120  }
   0x9   : > { %v2457_v3 = vadd.s32 (!%p113_p2), 8, %v2452_v2  ;;  %vm315_vm1 = vcmp.lt.s32.totalorder (!%p113_p2), %v2452_v2, 1  ;;  %vm412_vm3 = vcmp.lt.s32.totalorder (!%p113_p2), %v2452_v2, 7  ;;  %vm247_vm4 = vcmp.gt.s32.totalorder (!%p113_p2), %v2452_v2, 0  ;;  %s2423_s25 = smov (!%p113_p2), 28   ;;  %s2424_s26 = smov (!%p113_p2), 32  }
   0xa   : > { %vm1753_vm13 = vcmask (!%p113_p2), 293888   ;;  %vm2164_vm15 = vcmask (!%p113_p2), 24576  }
   0xb   : > { %vm250_vm2 = vcmp.lt.s32.totalorder (!%p113_p2), %v2457_v3, 15 }
   0xd   : > { %s3334_s10 = smov (!%p132_p3, %s2213_s10), 1  ;;  %v251_v7 = vld [vmem:[#allocation2] sm:$0xff]  ;;  %v252_v8 = vld [vmem:[#allocation2 + $0x8] sm:$0xff] }
   0xe   : > { %s2241_s11 = sshll.u32 %s3334_s10, 7  ;;  %v299_v14 = vrot.slane %v252_v8, 7  ;;  %v396_v15 = vrot.slane %v252_v8, 1  ;;  %v493_v16 = vpack.c.bf16 %v252_v8, %v251_v7  ;;  %v283_v17 = vrot.slane %v251_v7, 7  ;;  %s139_s3 = scalar_lea.vmem %s3332_s2, %s3334_s10 }
   0xf   : > { %s2464_s14 = scalar_lea.vmem %s3330_s0, %s2241_s11  ;;  %v380_v21 = vrot.slane %v251_v7, 1 }
  0x10   : > { %v2306_v4 = vld [vmem:[%s2464_s14 + $0x8] sm:$0xff]   ;;  %v2243_v5 = vld [vmem:[%s2464_s14] sm:$0xff]   ;;  %v2307_v6 = vld [vmem:[%s2464_s14 + $0x10] sm:$0xff]   ;;  %1086 = vrot.lane.b32.xlu0 %v493_v16, %s2417_s15  ;;  %v2501_v41 = vsel %vm315_vm1, %v283_v17, %v299_v14  ;;  %v332_v42 = vsel %vm315_vm1, %v299_v14, %v283_v17 }
  0x11   : > { %v2248_v9 = vunpack.c.l.bf16 %v2306_v4  ;;  %v2249_v10 = vunpack.c.h.bf16 %v2306_v4  ;;  %v2244_v11 = vunpack.c.l.bf16 %v2243_v5  ;;  %v2245_v12 = vunpack.c.h.bf16 %v2243_v5  ;;  %v2308_v13 = vld [vmem:[%s2464_s14 + $0x18] sm:$0xff]   ;;  %v2309_v18 = vld [vmem:[%s2464_s14 + $0x20] sm:$0xff]   ;;  %v2310_v19 = vld [vmem:[%s2464_s14 + $0x28] sm:$0xff]  }
  0x12   : > { %v2311_v20 = vld [vmem:[%s2464_s14 + $0x30] sm:$0xff]   ;;  %v2252_v22 = vunpack.c.l.bf16 %v2307_v6  ;;  %v2253_v23 = vunpack.c.h.bf16 %v2307_v6  ;;  %v2256_v24 = vunpack.c.l.bf16 %v2308_v13  ;;  %v2312_v25 = vld [vmem:[%s2464_s14 + $0x38] sm:$0xff]   ;;  %v2257_v26 = vunpack.c.h.bf16 %v2308_v13  ;;  %v2313_v30 = vld [vmem:[%s2464_s14 + $0x40] sm:$0xff]  }
  0x13   : > { %214 = vst.msk [vmem:[#allocation2 + $0x20] sm:$0xff] %vm141_vm0, %v2248_v9  ;;  %215 = vst.msk [vmem:[#allocation2 + $0x28] sm:$0xff] %vm141_vm0, %v2249_v10  ;;  %v2260_v27 = vunpack.c.l.bf16 %v2309_v18  ;;  %v2261_v28 = vunpack.c.h.bf16 %v2309_v18  ;;  %v2264_v29 = vunpack.c.l.bf16 %v2310_v19  ;;  %v413_v31 = vsel %vm412_vm3, %v380_v21, %v396_v15  ;;  %v2314_v35 = vld [vmem:[%s2464_s14 + $0x48] sm:$0xff]   ;;  %v2403_v16 = vld [vmem:[%s3331_s1] sm:$0xff]  }
  0x14   : > { %212 = vst.msk [vmem:[#allocation2 + $0x10] sm:$0xff] %vm141_vm0, %v2244_v11  ;;  %213 = vst.msk [vmem:[#allocation2 + $0x18] sm:$0xff] %vm141_vm0, %v2245_v12  ;;  %v429_v32 = vsel %vm412_vm3, %v396_v15, %v380_v21  ;;  %v2265_v33 = vunpack.c.h.bf16 %v2310_v19  ;;  %v2268_v34 = vunpack.c.l.bf16 %v2311_v20  ;;  %v2269_v37 = vunpack.c.h.bf16 %v2311_v20  ;;  %2340 = vmatprep.subr.bf16.mxu0 %v2403_v16  ;;  %2378 = vmatprep.subr.bf16.mxu1 %v2403_v16 }
  0x15   : > { %216 = vst.msk [vmem:[#allocation2 + $0x30] sm:$0xff] %vm141_vm0, %v2252_v22  ;;  %217 = vst.msk [vmem:[#allocation2 + $0x38] sm:$0xff] %vm141_vm0, %v2253_v23  ;;  %v446_v36 = vsel %vm250_vm2, %v429_v32, 0.0  ;;  %v2272_v38 = vunpack.c.l.bf16 %v2312_v25  ;;  %v2273_v39 = vunpack.c.h.bf16 %v2312_v25  ;;  %v2276_v43 = vunpack.c.l.bf16 %v2313_v30  ;;  %2341 = vmatpush3.bf16.msra.mxu0 %v2403_v16  ;;  %v2404_v22 = vld [vmem:[%s3331_s1 + $0x8] sm:$0xff]   ;;  %2381 = vmatpush3.bf16.msra.mxu1 %v2403_v16 }
  0x16   : > { %218 = vst.msk [vmem:[#allocation2 + $0x40] sm:$0xff] %vm141_vm0, %v2256_v24  ;;  %219 = vst.msk [vmem:[#allocation2 + $0x48] sm:$0xff] %vm141_vm0, %v2257_v26  ;;  %v509_v40 = vpack.c.bf16 %v446_v36, %v413_v31  ;;  %v2510_v44 = vsel %vm247_vm4, %v332_v42, 0.0  ;;  %v2277_v45 = vunpack.c.h.bf16 %v2313_v30  ;;  %v2280_v46 = vunpack.c.l.bf16 %v2314_v35  ;;  %2342 = vmatprep.subr.bf16.mxu0 %v2404_v22  ;;  %2379 = vmatprep.subr.bf16.mxu1 %v2404_v22  ;;  %v2316_v42 = vld [vmem:[%s2464_s14 + $0x58] sm:$0xff]  }
  0x17   : > { %220 = vst.msk [vmem:[#allocation2 + $0x50] sm:$0xff] %vm141_vm0, %v2260_v27  ;;  %221 = vst.msk [vmem:[#allocation2 + $0x58] sm:$0xff] %vm141_vm0, %v2261_v28  ;;  %v477_v47 = vpack.c.bf16 %v2501_v41, %v2510_v44  ;;  %v2281_v48 = vunpack.c.h.bf16 %v2314_v35 }
  0x18   : > { %222 = vst.msk [vmem:[#allocation2 + $0x60] sm:$0xff] %vm141_vm0, %v2264_v29  ;;  %223 = vst.msk [vmem:[#allocation2 + $0x68] sm:$0xff] %vm141_vm0, %v2265_v33  ;;  %1134 = vrot.lane.b32.xlu1 %v509_v40, %s2418_s16  ;;  %v2315_v40 = vld [vmem:[%s2464_s14 + $0x50] sm:$0xff]  }
  0x19   : > { %224 = vst.msk [vmem:[#allocation2 + $0x70] sm:$0xff] %vm141_vm0, %v2268_v34  ;;  %225 = vst.msk [vmem:[#allocation2 + $0x78] sm:$0xff] %vm141_vm0, %v2269_v37  ;;  %2343 = vmatpush3.bf16.msra.mxu0 %v2404_v22  ;;  %2382 = vmatpush3.bf16.msra.mxu1 %v2404_v22 }
  0x1a   : > { %226 = vst.msk [vmem:[#allocation2 + $0x80] sm:$0xff] %vm141_vm0, %v2272_v38  ;;  %227 = vst.msk [vmem:[#allocation2 + $0x88] sm:$0xff] %vm141_vm0, %v2273_v39  ;;  %v527_v49 = vld [vmem:[#allocation2 + $0x20] sm:$0xff]  ;;  %v528_v50 = vld [vmem:[#allocation2 + $0x28] sm:$0xff] }
  0x1b   : > { %228 = vst.msk [vmem:[#allocation2 + $0x90] sm:$0xff] %vm141_vm0, %v2276_v43  ;;  %v253_v51 = vld [vmem:[#allocation2 + $0x10] sm:$0xff]  ;;  %229 = vst.msk [vmem:[#allocation2 + $0x98] sm:$0xff] %vm141_vm0, %v2277_v45  ;;  %v574_v52 = vrot.slane %v528_v50, 7  ;;  %v2518_v53 = vpack.c.bf16 %v528_v50, %v527_v49  ;;  %v558_v54 = vrot.slane %v527_v49, 7  ;;  %v254_v55 = vld [vmem:[#allocation2 + $0x18] sm:$0xff] }
  0x1c   : > { %230 = vst.msk [vmem:[#allocation2 + $0xa0] sm:$0xff] %vm141_vm0, %v2280_v46  ;;  %231 = vst.msk [vmem:[#allocation2 + $0xa8] sm:$0xff] %vm141_vm0, %v2281_v48  ;;  %v670_v56 = vrot.slane %v528_v50, 1  ;;  %v300_v57 = vrot.slane %v254_v55, 7  ;;  %v397_v58 = vrot.slane %v254_v55, 1  ;;  %v494_v59 = vpack.c.bf16 %v254_v55, %v253_v51  ;;  %v800_v0 = vld [vmem:[#allocation2 + $0x30] sm:$0xff] }
  0x1d   : > { %1232 = vrot.lane.b32.xlu1 %v2518_v53, %s2419_s17  ;;  %v654_v60 = vrot.slane %v527_v49, 1  ;;  %v284_v61 = vrot.slane %v253_v51, 7  ;;  %v381_v62 = vrot.slane %v253_v51, 1  ;;  %v606_v63 = vsel %vm315_vm1, %v574_v52, %v558_v54  ;;  %v801_v1 = vld [vmem:[#allocation2 + $0x38] sm:$0xff]  ;;  %v531_v31 = vld [vmem:[#allocation2 + $0x40] sm:$0xff]  ;;  %v532_v32 = vld [vmem:[#allocation2 + $0x48] sm:$0xff] }
  0x1e   : > { %1088 = vrot.lane.b32.xlu0 %v494_v59, %s2417_s15  ;;  %v590_v10 = vsel %vm315_vm1, %v558_v54, %v574_v52  ;;  %v623_v11 = vsel %vm247_vm4, %v606_v63, 0.0  ;;  %v831_v14 = vrot.slane %v800_v0, 7  ;;  %v847_v15 = vrot.slane %v801_v1, 7  ;;  %v2405_v38 = vld [vmem:[%s3331_s1 + $0x10] ss:$0 sps:$4 sm:$0x33]  }
  0x1f   : > { %v414_v4 = vsel %vm412_vm3, %v381_v62, %v397_v58  ;;  %v430_v5 = vsel %vm412_vm3, %v397_v58, %v381_v62  ;;  %v589_v6 = vsel %vm315_vm1, %v284_v61, %v300_v57  ;;  %v605_v7 = vsel %vm315_vm1, %v300_v57, %v284_v61  ;;  %2384 = vmatprep.subr.msk.bf16.mxu0 %vm1786_vm5, %v2405_v38  ;;  %v805_v54 = vld [vmem:[#allocation2 + $0x58] sm:$0xff] }
  0x20   : > { %v448_v8 = vsel %vm250_vm2, %v430_v5, 0.0  ;;  %v621_v9 = vsel %vm247_vm4, %v605_v7, 0.0  ;;  %v702_v13 = vsel %vm412_vm3, %v670_v56, %v654_v60  ;;  %v2551_v18 = vpack.c.bf16 %v590_v10, %v623_v11  ;;  %2385 = vmatprep.subr.msk.bf16.mxu1 %vm1786_vm5, %v2405_v38 }
  0x21   : > { %v510_v12 = vpack.c.bf16 %v448_v8, %v414_v4  ;;  %v2548_v17 = vpack.c.bf16 %v589_v6, %v621_v9  ;;  %v686_v19 = vsel %vm412_vm3, %v654_v60, %v670_v56  ;;  %v720_v20 = vsel %vm250_vm2, %v702_v13, 0.0  ;;  %v2317_v56 = vld [vmem:[%s2464_s14 + $0x60] sm:$0xff]  }
  0x22   : > { %1230 = vrot.lane.b32.xlu0 %v494_v59, %s2419_s17  ;;  %v879_v21 = vsel %vm315_vm1, %v847_v15, %v831_v14  ;;  %v782_v23 = vpack.c.bf16 %v720_v20, %v686_v19  ;;  %v863_v24 = vsel %vm315_vm1, %v831_v14, %v847_v15  ;;  %v927_v27 = vrot.slane %v800_v0, 1  ;;  %v535_v13 = vld [vmem:[#allocation2 + $0x60] sm:$0xff]  ;;  %v536_v14 = vld [vmem:[#allocation2 + $0x68] sm:$0xff] }
  0x23   : > { %1136 = vrot.lane.b32.xlu1 %v510_v12, %s2418_s16  ;;  %v896_v25 = vsel %vm247_vm4, %v879_v21, 0.0  ;;  %v943_v28 = vrot.slane %v801_v1, 1  ;;  %v1039_v29 = vpack.c.bf16 %v801_v1, %v800_v0  ;;  %v560_v35 = vrot.slane %v531_v31, 7  ;;  %v2318_v15 = vld [vmem:[%s2464_s14 + $0x68] sm:$0xff]  }
  0x24   : > { %v2572_v26 = vpack.c.bf16 %v863_v24, %v896_v25  ;;  %v576_v36 = vrot.slane %v532_v32, 7  ;;  %v656_v46 = vrot.slane %v531_v31, 1  ;;  %v1788_v48 = vsel %vm1786_vm5, %v2405_v38, 0 }
  0x25   : > { %v975_v30 = vsel %vm412_vm3, %v943_v28, %v927_v27  ;;  %v959_v33 = vsel %vm412_vm3, %v927_v27, %v943_v28  ;;  %v672_v49 = vrot.slane %v532_v32, 1  ;;  %2345 = vmatpush3.bf16.msra.mxu0 %v1788_v48  ;;  %v2284_v50 = vunpack.c.l.bf16 %v2315_v40  ;;  %2383 = vmatpush3.bf16.msra.mxu1 %v1788_v48 }
  0x26   : > { %1182 = vrot.lane.b32.xlu0 %v2548_v17, %s2420_s22  ;;  %v993_v34 = vsel %vm250_vm2, %v975_v30, 0.0  ;;  %v608_v39 = vsel %vm315_vm1, %v576_v36, %v560_v35  ;;  %v592_v43 = vsel %vm315_vm1, %v560_v35, %v576_v36  ;;  %v2285_v51 = vunpack.c.h.bf16 %v2315_v40 }
  0x27   : > { %1184 = vrot.lane.b32.xlu1 %v2551_v18, %s2420_s22  ;;  %v1055_v37 = vpack.c.bf16 %v993_v34, %v959_v33  ;;  %v627_v45 = vsel %vm247_vm4, %v608_v39, 0.0  ;;  %v2288_v52 = vunpack.c.l.bf16 %v2316_v42  ;;  %v2289_v55 = vunpack.c.h.bf16 %v2316_v42  ;;  %232 = vst.msk [vmem:[#allocation2 + $0xb0] sm:$0xff] %vm141_vm0, %v2284_v50  ;;  %v2319_v33 = vld [vmem:[%s2464_s14 + $0x70] sm:$0xff]  }
  0x28   : > { %v2606_v57 = vpack.c.bf16 %v592_v43, %v627_v45  ;;  %233 = vst.msk [vmem:[#allocation2 + $0xb8] sm:$0xff] %vm141_vm0, %v2285_v51  ;;  %v2292_v58 = vunpack.c.l.bf16 %v2317_v56  ;;  %v2293_v59 = vunpack.c.h.bf16 %v2317_v56  ;;  %v704_v60 = vsel %vm412_vm3, %v672_v49, %v656_v46  ;;  %v540_v56 = vld [vmem:[#allocation2 + $0x88] sm:$0xff] }
  0x29   : > { %234 = vst.msk [vmem:[#allocation2 + $0xc0] sm:$0xff] %vm141_vm0, %v2288_v52  ;;  %235 = vst.msk [vmem:[#allocation2 + $0xc8] sm:$0xff] %vm141_vm0, %v2289_v55  ;;  %v849_v62 = vrot.slane %v805_v54, 7  ;;  %v768_v63 = vpack.c.bf16 %v532_v32, %v531_v31  ;;  %v688_v0 = vsel %vm412_vm3, %v656_v46, %v672_v49  ;;  %v724_v1 = vsel %vm250_vm2, %v704_v60, 0.0  ;;  %v808_v31 = vld [vmem:[#allocation2 + $0x70] sm:$0xff]  ;;  %v809_v32 = vld [vmem:[#allocation2 + $0x78] sm:$0xff] }
  0x2a   : > { %1278 = vrot.lane.b32.xlu0 %v510_v12, %s2421_s23  ;;  %236 = vst.msk [vmem:[#allocation2 + $0xd0] sm:$0xff] %vm141_vm0, %v2292_v58  ;;  %237 = vst.msk [vmem:[#allocation2 + $0xd8] sm:$0xff] %vm141_vm0, %v2293_v59  ;;  %v784_v5 = vpack.c.bf16 %v724_v1, %v688_v0  ;;  %v945_v10 = vrot.slane %v805_v54, 1  ;;  %v2296_v20 = vunpack.c.l.bf16 %v2318_v15  ;;  %v2297_v21 = vunpack.c.h.bf16 %v2318_v15  ;;  %v539_v55 = vld [vmem:[#allocation2 + $0x80] sm:$0xff]  ;;  %v2320_v58 = vld [vmem:[%s2464_s14 + $0x78] sm:$0xff]  }
  0x2b   : > { %1280 = vrot.lane.b32.xlu1 %v782_v23, %s2421_s23  ;;  %v562_v22 = vrot.slane %v535_v13, 7  ;;  %v674_v30 = vrot.slane %v536_v14, 1  ;;  %v2300_v35 = vunpack.c.l.bf16 %v2319_v33  ;;  %v2301_v36 = vunpack.c.h.bf16 %v2319_v33 }
  0x2c   : > { %238 = vst.msk [vmem:[#allocation2 + $0xe0] sm:$0xff] %vm141_vm0, %v2296_v20  ;;  %239 = vst.msk [vmem:[#allocation2 + $0xe8] sm:$0xff] %vm141_vm0, %v2297_v21  ;;  %v835_v38 = vrot.slane %v808_v31, 7  ;;  %v851_v39 = vrot.slane %v809_v32, 7  ;;  %v770_v40 = vpack.c.bf16 %v536_v14, %v535_v13  ;;  %v931_v51 = vrot.slane %v808_v31, 1 }
  0x2d   : > { %240 = vst.msk [vmem:[#allocation2 + $0xf0] sm:$0xff] %vm141_vm0, %v2300_v35  ;;  %241 = vst.msk [vmem:[#allocation2 + $0xf8] sm:$0xff] %vm141_vm0, %v2301_v36  ;;  %v947_v52 = vrot.slane %v809_v32, 1  ;;  %v580_v0 = vrot.slane %v540_v56, 7  ;;  %v543_v36 = vld [vmem:[#allocation2 + $0xa0] sm:$0xff] }
  0x2e   : > { %1326 = vrot.lane.b32.xlu0 %v2551_v18, %s2422_s24  ;;  %v883_v45 = vsel %vm315_vm1, %v851_v39, %v835_v38  ;;  %v867_v48 = vsel %vm315_vm1, %v835_v38, %v851_v39 }
  0x2f   : > { %1328 = vrot.lane.b32.xlu1 %v2572_v26, %s2422_s24  ;;  %v904_v49 = vsel %vm247_vm4, %v883_v45, 0.0  ;;  %v963_v59 = vsel %vm412_vm3, %v931_v51, %v947_v52 }
  0x30   : > { %v2688_v50 = vpack.c.bf16 %v867_v48, %v904_v49 }
  0x32   : > { %1374 = vrot.lane.b32.xlu0 %v2518_v53, %s2423_s25 }
  0x33   : > { %1376 = vrot.lane.b32.xlu1 %v1039_v29, %s2423_s25 }
  0x36   : > { %1422 = vrot.lane.b32.xlu0 %v782_v23, %s2424_s26 }
  0x37   : > { %1090 = vrot.lane.b32.xlu1 %v2518_v53, %s2417_s15  ;;  %v804_v53 = vld [vmem:[#allocation2 + $0x50] sm:$0xff] }
  0x38   : > { %v833_v61 = vrot.slane %v804_v53, 7  ;;  %v929_v9 = vrot.slane %v804_v53, 1  ;;  %v1041_v11 = vpack.c.bf16 %v805_v54, %v804_v53  ;;  %v1043_v53 = vpack.c.bf16 %v809_v32, %v808_v31 }
  0x39   : > { %v979_v54 = vsel %vm412_vm3, %v947_v52, %v931_v51 }
  0x3a   : > { %1424 = vrot.lane.b32.xlu0 %v1055_v37, %s2424_s26  ;;  %v881_v4 = vsel %vm315_vm1, %v849_v62, %v833_v61  ;;  %v865_v6 = vsel %vm315_vm1, %v833_v61, %v849_v62  ;;  %v977_v12 = vsel %vm412_vm3, %v945_v10, %v929_v9  ;;  %v961_v16 = vsel %vm412_vm3, %v929_v9, %v945_v10  ;;  %v812_v10 = vld [vmem:[#allocation2 + $0x90] sm:$0xff] }
  0x3b   : > { %1092 = vrot.lane.b32.xlu1 %v1039_v29, %s2417_s15  ;;  %v900_v7 = vsel %vm247_vm4, %v881_v4, 0.0  ;;  %v997_v19 = vsel %vm250_vm2, %v977_v12, 0.0  ;;  %v1001_v60 = vsel %vm250_vm2, %v979_v54, 0.0  ;;  %v2304_v61 = vunpack.c.l.bf16 %v2320_v58 }
  0x3c   : > { %v2634_v8 = vpack.c.bf16 %v865_v6, %v900_v7  ;;  %v1057_v24 = vpack.c.bf16 %v997_v19, %v961_v16  ;;  %v2305_v62 = vunpack.c.h.bf16 %v2320_v58  ;;  %v1059_v1 = vpack.c.bf16 %v1001_v60, %v963_v59  ;;  %v2770_v60 = vld [vmem:[#allocation2 + $0xb0] sm:$0xff] }
  0x3d   : > { %242 = vst.msk [vmem:[#allocation2 + $0x100] sm:$0xff] %vm141_vm0, %v2304_v61  ;;  %v660_v7 = vrot.slane %v539_v55, 1  ;;  %v676_v9 = vrot.slane %v540_v56, 1  ;;  %v772_v16 = vpack.c.bf16 %v540_v56, %v539_v55  ;;  %v662_v56 = vrot.slane %v543_v36, 1  ;;  %v2772_v61 = vld [vmem:[#allocation2 + $0xb8] sm:$0xff] }
  0x3e   : > { %1138 = vrot.lane.b32.xlu0 %v782_v23, %s2418_s16  ;;  %v578_v23 = vrot.slane %v536_v14, 7  ;;  %243 = vst.msk [vmem:[#allocation2 + $0x108] sm:$0xff] %vm141_vm0, %v2305_v62  ;;  %v837_v14 = vrot.slane %v812_v10, 7  ;;  %v839_v44 = vrot.slane %v2770_v60, 7 }
  0x3f   : > { %1140 = vrot.lane.b32.xlu1 %v1055_v37, %s2418_s16  ;;  %v692_v19 = vsel %vm412_vm3, %v660_v7, %v676_v9 }
  0x40   : > { %v610_v25 = vsel %vm315_vm1, %v578_v23, %v562_v22  ;;  %v594_v27 = vsel %vm315_vm1, %v562_v22, %v578_v23 }
  0x41   : > { %v631_v28 = vsel %vm247_vm4, %v610_v25, 0.0 }
  0x42   : > { %1186 = vrot.lane.b32.xlu0 %v2572_v26, %s2420_s22  ;;  %v2664_v34 = vpack.c.bf16 %v594_v27, %v631_v28 }
  0x43   : > { %1188 = vrot.lane.b32.xlu1 %v2606_v57, %s2420_s22 }
  0x46   : > { %1234 = vrot.lane.b32.xlu0 %v1039_v29, %s2419_s17  ;;  %v658_v29 = vrot.slane %v535_v13, 1  ;;  %v708_v13 = vsel %vm412_vm3, %v676_v9, %v660_v7 }
  0x47   : > { %1236 = vrot.lane.b32.xlu1 %v768_v63, %s2419_s17  ;;  %v732_v20 = vsel %vm250_vm2, %v708_v13, 0.0 }
  0x48   : > { %v690_v42 = vsel %vm412_vm3, %v658_v29, %v674_v30  ;;  %v788_v22 = vpack.c.bf16 %v732_v20, %v692_v19 }
  0x4a   : > { %1282 = vrot.lane.b32.xlu0 %v1055_v37, %s2421_s23  ;;  %v706_v37 = vsel %vm412_vm3, %v674_v30, %v658_v29  ;;  %v933_v29 = vrot.slane %v812_v10, 1 }
  0x4b   : > { %1284 = vrot.lane.b32.xlu1 %v784_v5, %s2421_s23  ;;  %v728_v43 = vsel %vm250_vm2, %v706_v37, 0.0  ;;  %v544_v37 = vld [vmem:[#allocation2 + $0xa8] sm:$0xff] }
  0x4c   : > { %v786_v46 = vpack.c.bf16 %v728_v43, %v690_v42  ;;  %v566_v43 = vrot.slane %v543_v36, 7  ;;  %v582_v45 = vrot.slane %v544_v37, 7  ;;  %v678_v58 = vrot.slane %v544_v37, 1 }
  0x4e   : > { %1330 = vrot.lane.b32.xlu0 %v2606_v57, %s2422_s24  ;;  %v614_v51 = vsel %vm315_vm1, %v582_v45, %v566_v43  ;;  %v710_v41 = vsel %vm412_vm3, %v678_v58, %v662_v56  ;;  %v694_v9 = vsel %vm412_vm3, %v662_v56, %v678_v58 }
  0x4f   : > { %1332 = vrot.lane.b32.xlu1 %v2634_v8, %s2422_s24  ;;  %v639_v54 = vsel %vm247_vm4, %v614_v51, 0.0 }
  0x52   : > { %1378 = vrot.lane.b32.xlu0 %v768_v63, %s2423_s25 }
  0x53   : > { %1380 = vrot.lane.b32.xlu1 %v1041_v11, %s2423_s25 }
  0x56   : > { %1426 = vrot.lane.b32.xlu0 %v784_v5, %s2424_s26 }
  0x57   : > { %1094 = vrot.lane.b32.xlu1 %v768_v63, %s2417_s15  ;;  %v564_v63 = vrot.slane %v539_v55, 7 }
  0x59   : > { %v612_v4 = vsel %vm315_vm1, %v580_v0, %v564_v63 }
  0x5a   : > { %1428 = vrot.lane.b32.xlu0 %v1057_v24, %s2424_s26  ;;  %v635_v6 = vsel %vm247_vm4, %v612_v4, 0.0 }
  0x5b   : > { %1096 = vrot.lane.b32.xlu1 %v1041_v11, %s2417_s15 }
  0x5e   : > { %1142 = vrot.lane.b32.xlu0 %v784_v5, %s2418_s16  ;;  %v596_v5 = vsel %vm315_vm1, %v564_v63, %v580_v0 }
  0x5f   : > { %1144 = vrot.lane.b32.xlu1 %v1057_v24, %s2418_s16  ;;  %v2717_v12 = vpack.c.bf16 %v596_v5, %v635_v6  ;;  %v774_v5 = vpack.c.bf16 %v544_v37, %v543_v36  ;;  %v951_v37 = vrot.slane %v2772_v61, 1 }
  0x62   : > { %1190 = vrot.lane.b32.xlu0 %v2634_v8, %s2420_s22 }
  0x63   : > { %1192 = vrot.lane.b32.xlu1 %v2664_v34, %s2420_s22 }
  0x66   : > { %1238 = vrot.lane.b32.xlu0 %v1041_v11, %s2419_s17  ;;  %v813_v11 = vld [vmem:[#allocation2 + $0x98] sm:$0xff] }
  0x67   : > { %1240 = vrot.lane.b32.xlu1 %v770_v40, %s2419_s17  ;;  %v853_v15 = vrot.slane %v813_v11, 7  ;;  %v949_v30 = vrot.slane %v813_v11, 1  ;;  %v1045_v32 = vpack.c.bf16 %v813_v11, %v812_v10  ;;  %v736_v10 = vsel %vm250_vm2, %v710_v41, 0.0 }
  0x68   : > { %v790_v20 = vpack.c.bf16 %v736_v10, %v694_v9 }
  0x69   : > { %v885_v21 = vsel %vm315_vm1, %v853_v15, %v837_v14  ;;  %v869_v23 = vsel %vm315_vm1, %v837_v14, %v853_v15  ;;  %v981_v35 = vsel %vm412_vm3, %v949_v30, %v933_v29  ;;  %v965_v38 = vsel %vm412_vm3, %v933_v29, %v949_v30 }
  0x6a   : > { %1286 = vrot.lane.b32.xlu0 %v1057_v24, %s2421_s23  ;;  %v908_v24 = vsel %vm247_vm4, %v885_v21, 0.0  ;;  %v1005_v39 = vsel %vm250_vm2, %v981_v35, 0.0 }
  0x6b   : > { %1288 = vrot.lane.b32.xlu1 %v786_v46, %s2421_s23  ;;  %v2739_v28 = vpack.c.bf16 %v869_v23, %v908_v24 }
  0x6e   : > { %1334 = vrot.lane.b32.xlu0 %v2664_v34, %s2422_s24 }
  0x6f   : > { %1336 = vrot.lane.b32.xlu1 %v2688_v50, %s2422_s24 }
  0x72   : > { %1382 = vrot.lane.b32.xlu0 %v770_v40, %s2423_s25 }
  0x73   : > { %1384 = vrot.lane.b32.xlu1 %v1043_v53, %s2423_s25 }
  0x76   : > { %1430 = vrot.lane.b32.xlu0 %v786_v46, %s2424_s26 }
  0x77   : > { %1098 = vrot.lane.b32.xlu1 %v770_v40, %s2417_s15 }
  0x7a   : > { %1432 = vrot.lane.b32.xlu0 %v1059_v1, %s2424_s26 }
  0x7b   : > { %1100 = vrot.lane.b32.xlu1 %v1043_v53, %s2417_s15 }
  0x7e   : > { %1146 = vrot.lane.b32.xlu0 %v786_v46, %s2418_s16  ;;  %v1061_v46 = vpack.c.bf16 %v1005_v39, %v965_v38 }
  0x7f   : > { %1148 = vrot.lane.b32.xlu1 %v1059_v1, %s2418_s16 }
  0x82   : > { %1194 = vrot.lane.b32.xlu0 %v2688_v50, %s2420_s22  ;;  %v1087_v25 = vpop.permute.xlu0 %1086 }
  0x83   : > { %1196 = vrot.lane.b32.xlu1 %v2717_v12, %s2420_s22  ;;  %v1456_v59 = vsel %vm141_vm0, %v477_v47, %v1087_v25  ;;  %v855_v47 = vrot.slane %v2772_v61, 7 }
  0x85   : > { %v887_v15 = vsel %vm315_vm1, %v855_v47, %v839_v44  ;;  %v871_v23 = vsel %vm315_vm1, %v839_v44, %v855_v47  ;;  %v820_v47 = vld [vmem:[#allocation2 + $0xd0] sm:$0xff] }
  0x86   : > { %1242 = vrot.lane.b32.xlu0 %v1043_v53, %s2419_s17  ;;  %v598_v53 = vsel %vm315_vm1, %v566_v43, %v582_v45  ;;  %v912_v24 = vsel %vm247_vm4, %v887_v15, 0.0  ;;  %v841_v10 = vrot.slane %v820_v47, 7 }
  0x87   : > { %1244 = vrot.lane.b32.xlu1 %v772_v16, %s2419_s17  ;;  %v2775_v62 = vpack.c.bf16 %v598_v53, %v639_v54 }
  0x8a   : > { %1290 = vrot.lane.b32.xlu0 %v1059_v1, %s2421_s23  ;;  %v1135_v27 = vpop.permute.xlu1 %1134 }
  0x8b   : > { %1292 = vrot.lane.b32.xlu1 %v788_v22, %s2421_s23  ;;  %v1504_v0 = vsel %vm1502_vm6, %v1456_v59, %v1135_v27 }
  0x8e   : > { %1338 = vrot.lane.b32.xlu0 %v2717_v12, %s2422_s24 }
  0x8f   : > { %1340 = vrot.lane.b32.xlu1 %v2739_v28, %s2422_s24  ;;  %v2745_v31 = vpop.permute.xlu1 %1232 }
  0x90   : > { %v1089_v33 = vpop.permute.xlu0 %1088 }
  0x91   : > { %v1459_v6 = vsel %vm141_vm0, %v2548_v17, %v1089_v33  ;;  %v2815_v33 = vpack.c.bf16 %v871_v23, %v912_v24 }
  0x92   : > { %1386 = vrot.lane.b32.xlu0 %v772_v16, %s2423_s25 }
  0x93   : > { %1388 = vrot.lane.b32.xlu1 %v1045_v32, %s2423_s25 }
  0x94   : > { %v1231_v40 = vpop.permute.xlu0 %1230 }
  0x95   : > { %v1137_v42 = vpop.permute.xlu1 %1136 }
  0x96   : > { %1434 = vrot.lane.b32.xlu0 %v788_v22, %s2424_s26  ;;  %v1506_v11 = vsel %vm1502_vm6, %v1459_v6, %v1137_v42 }
  0x97   : > { %1102 = vrot.lane.b32.xlu1 %v772_v16, %s2417_s15 }
  0x98   : > { %v1183_v48 = vpop.permute.xlu0 %1182 }
  0x99   : > { %v1185_v49 = vpop.permute.xlu1 %1184  ;;  %v1537_v4 = vsel %vm1535_vm7, %v1504_v0, %v1183_v48  ;;  %v548_v48 = vld [vmem:[#allocation2 + $0xc8] sm:$0xff] }
  0x9a   : > { %1436 = vrot.lane.b32.xlu0 %v1061_v46, %s2424_s26  ;;  %v1570_v13 = vsel %vm1568_vm8, %v1537_v4, %v1231_v40  ;;  %v1539_v16 = vsel %vm1535_vm7, %v1506_v11, %v1185_v49  ;;  %v1047_v40 = vpack.c.bf16 %v2772_v61, %v2770_v60  ;;  %v680_v44 = vrot.slane %v548_v48, 1  ;;  %v821_v4 = vld [vmem:[#allocation2 + $0xd8] sm:$0xff] }
  0x9b   : > { %1104 = vrot.lane.b32.xlu1 %v1045_v32, %s2417_s15  ;;  %v1572_v25 = vsel %vm1568_vm8, %v1539_v16, %v2745_v31  ;;  %v935_v31 = vrot.slane %v2770_v60, 1  ;;  %v857_v11 = vrot.slane %v821_v4, 7 }
  0x9c   : > { %v1279_v52 = vpop.permute.xlu0 %1278 }
  0x9d   : > { %v1281_v55 = vpop.permute.xlu1 %1280  ;;  %v1603_v17 = vsel %vm1601_vm9, %v1570_v13, %v1279_v52  ;;  %v983_v43 = vsel %vm412_vm3, %v951_v37, %v935_v31  ;;  %v967_v49 = vsel %vm412_vm3, %v935_v31, %v951_v37 }
  0x9e   : > { %1150 = vrot.lane.b32.xlu0 %v788_v22, %s2418_s16  ;;  %v1605_v30 = vsel %vm1601_vm9, %v1572_v25, %v1281_v55  ;;  %v1009_v51 = vsel %vm250_vm2, %v983_v43, 0.0  ;;  %v584_v55 = vrot.slane %v548_v48, 7 }
  0x9f   : > { %1152 = vrot.lane.b32.xlu1 %v1061_v46, %s2418_s16  ;;  %v1063_v56 = vpack.c.bf16 %v1009_v51, %v967_v49 }
  0xa0   : > { %v1327_v63 = vpop.permute.xlu0 %1326 }
  0xa1   : > { %v1329_v1 = vpop.permute.xlu1 %1328  ;;  %v1636_v19 = vsel %vm1634_vm10, %v1603_v17, %v1327_v63 }
  0xa2   : > { %1198 = vrot.lane.b32.xlu0 %v2739_v28, %s2420_s22 }
  0xa3   : > { %1200 = vrot.lane.b32.xlu1 %v2775_v62, %s2420_s22 }
  0xa4   : > { %v1375_v7 = vpop.permute.xlu0 %1374 }
  0xa5   : > { %v1377_v14 = vpop.permute.xlu1 %1376  ;;  %v1669_v21 = vsel %vm1667_vm11, %v1636_v19, %v1375_v7 }
  0xa6   : > { %1246 = vrot.lane.b32.xlu0 %v1045_v32, %s2419_s17  ;;  %v1638_v32 = vsel %vm1634_vm10, %v1605_v30, %v1329_v1 }
  0xa7   : > { %1248 = vrot.lane.b32.xlu1 %v774_v5, %s2419_s17  ;;  %v1671_v35 = vsel %vm1667_vm11, %v1638_v32, %v1377_v14 }
  0xa8   : > { %v1423_v22 = vpop.permute.xlu0 %1422 }
  0xa9   : > { %v1091_v27 = vpop.permute.xlu1 %1090  ;;  %v1702_v29 = vsel %vm1700_vm12, %v1669_v21, %v1423_v22  ;;  %v889_v22 = vsel %vm315_vm1, %v857_v11, %v841_v10 }
  0xaa   : > { %1294 = vrot.lane.b32.xlu0 %v1061_v46, %s2421_s23  ;;  %2346 = vmatprep.mubr.msk.bf16.mxu0 %vm1753_vm13, %v1702_v29  ;;  %v547_v46 = vld [vmem:[#allocation2 + $0xc0] sm:$0xff]  ;;  %v1462_v13 = vsel %vm141_vm0, %v2551_v18, %v1091_v27 }
  0xab   : > { %1296 = vrot.lane.b32.xlu1 %v790_v20, %s2421_s23  ;;  %v568_v54 = vrot.slane %v547_v46, 7  ;;  %v664_v41 = vrot.slane %v547_v46, 1  ;;  %v776_v15 = vpack.c.bf16 %v548_v48, %v547_v46  ;;  %v937_v46 = vrot.slane %v820_v47, 1 }
  0xac   : > { %v1425_v36 = vpop.permute.xlu0 %1424  ;;  %v953_v48 = vrot.slane %v821_v4, 1 }
  0xad   : > { %v1704_v38 = vsel %vm1700_vm12, %v1671_v35, %v1425_v36  ;;  %v1093_v39 = vpop.permute.xlu1 %1092  ;;  %v616_v60 = vsel %vm315_vm1, %v584_v55, %v568_v54  ;;  %v600_v63 = vsel %vm315_vm1, %v568_v54, %v584_v55  ;;  %v712_v9 = vsel %vm412_vm3, %v680_v44, %v664_v41 }
  0xae   : > { %1342 = vrot.lane.b32.xlu0 %v2775_v62, %s2422_s24  ;;  %2347 = vmatmul.mubr.msk.bf16.vlgmr.msra.gmra.mrb[0].mxu0 %vm1753_vm13, %v1704_v38  ;;  %v643_v0 = vsel %vm247_vm4, %v616_v60, 0.0  ;;  %v696_v19 = vsel %vm412_vm3, %v664_v41, %v680_v44  ;;  %v1465_v23 = vsel %vm141_vm0, %v2572_v26, %v1093_v39  ;;  %v873_v36 = vsel %vm315_vm1, %v841_v10, %v857_v11 }
  0xaf   : > { %1344 = vrot.lane.b32.xlu1 %v2815_v33, %s2422_s24  ;;  %v916_v26 = vsel %vm247_vm4, %v889_v22, 0.0  ;;  %v985_v54 = vsel %vm412_vm3, %v953_v48, %v937_v46 }
  0xb0   : > { %v1139_v42 = vpop.permute.xlu0 %1138  ;;  %v1013_v60 = vsel %vm250_vm2, %v985_v54, 0.0 }
  0xb1   : > { %v1141_v45 = vpop.permute.xlu1 %1140  ;;  %v1508_v14 = vsel %vm1502_vm6, %v1462_v13, %v1139_v42  ;;  %v2887_v42 = vpack.c.bf16 %v873_v36, %v916_v26 }
  0xb2   : > { %1390 = vrot.lane.b32.xlu0 %v774_v5, %s2423_s25  ;;  %v1510_v25 = vsel %vm1502_vm6, %v1465_v23, %v1141_v45 }
  0xb3   : > { %1392 = vrot.lane.b32.xlu1 %v1047_v40, %s2423_s25 }
  0xb4   : > { %v1187_v52 = vpop.permute.xlu0 %1186 }
  0xb5   : > { %v1189_v53 = vpop.permute.xlu1 %1188  ;;  %v1541_v16 = vsel %vm1535_vm7, %v1508_v14, %v1187_v52  ;;  %v1049_v52 = vpack.c.bf16 %v821_v4, %v820_v47  ;;  %v824_v14 = vld [vmem:[#allocation2 + $0xf0] sm:$0xff] }
  0xb6   : > { %1438 = vrot.lane.b32.xlu0 %v790_v20, %s2424_s26  ;;  %v1543_v30 = vsel %vm1535_vm7, %v1510_v25, %v1189_v53 }
  0xb7   : > { %1106 = vrot.lane.b32.xlu1 %v774_v5, %s2417_s15  ;;  %v2848_v5 = vpack.c.bf16 %v600_v63, %v643_v0 }
  0xb8   : > { %v1235_v58 = vpop.permute.xlu0 %1234 }
  0xb9   : > { %v1237_v59 = vpop.permute.xlu1 %1236  ;;  %v1574_v18 = vsel %vm1568_vm8, %v1541_v16, %v1235_v58  ;;  %v552_v58 = vld [vmem:[#allocation2 + $0xe8] sm:$0xff] }
  0xba   : > { %1440 = vrot.lane.b32.xlu0 %v1063_v56, %s2424_s26  ;;  %v1576_v31 = vsel %vm1568_vm8, %v1543_v30, %v1237_v59  ;;  %v969_v59 = vsel %vm412_vm3, %v937_v46, %v953_v48  ;;  %v682_v13 = vrot.slane %v552_v58, 1 }
  0xbb   : > { %1108 = vrot.lane.b32.xlu1 %v1047_v40, %s2417_s15  ;;  %v1065_v41 = vpack.c.bf16 %v1013_v60, %v969_v59 }
  0xbc   : > { %v1283_v61 = vpop.permute.xlu0 %1282 }
  0xbd   : > { %v1285_v1 = vpop.permute.xlu1 %1284  ;;  %v1607_v24 = vsel %vm1601_vm9, %v1574_v18, %v1283_v61  ;;  %v843_v18 = vrot.slane %v824_v14, 7 }
  0xbe   : > { %1154 = vrot.lane.b32.xlu0 %v790_v20, %s2418_s16  ;;  %v740_v20 = vsel %vm250_vm2, %v712_v9, 0.0  ;;  %v1609_v39 = vsel %vm1601_vm9, %v1576_v31, %v1285_v1  ;;  %v586_v1 = vrot.slane %v552_v58, 7 }
  0xbf   : > { %1156 = vrot.lane.b32.xlu1 %v1063_v56, %s2418_s16  ;;  %v792_v29 = vpack.c.bf16 %v740_v20, %v696_v19 }
  0xc0   : > { %v1331_v6 = vpop.permute.xlu0 %1330 }
  0xc1   : > { %v1333_v7 = vpop.permute.xlu1 %1332  ;;  %v1640_v27 = vsel %vm1634_vm10, %v1607_v24, %v1331_v6 }
  0xc2   : > { %1202 = vrot.lane.b32.xlu0 %v2815_v33, %s2420_s22 }
  0xc3   : > { %1204 = vrot.lane.b32.xlu1 %v2848_v5, %s2420_s22 }
  0xc4   : > { %v1379_v17 = vpop.permute.xlu0 %1378 }
  0xc5   : > { %v1381_v21 = vpop.permute.xlu1 %1380  ;;  %v1673_v32 = vsel %vm1667_vm11, %v1640_v27, %v1379_v17 }
  0xc6   : > { %1250 = vrot.lane.b32.xlu0 %v1047_v40, %s2419_s17  ;;  %v1642_v40 = vsel %vm1634_vm10, %v1609_v39, %v1333_v7 }
  0xc7   : > { %1252 = vrot.lane.b32.xlu1 %v776_v15, %s2419_s17  ;;  %v1675_v43 = vsel %vm1667_vm11, %v1642_v40, %v1381_v21 }
  0xc8   : > { %v1427_v35 = vpop.permute.xlu0 %1426 }
  0xc9   : > { %v1706_v37 = vsel %vm1700_vm12, %v1673_v32, %v1427_v35  ;;  %v1095_v38 = vpop.permute.xlu1 %1094 }
  0xca   : > { %1298 = vrot.lane.b32.xlu0 %v1063_v56, %s2421_s23  ;;  %2350 = vmatprep.mubr.msk.bf16.mxu0 %vm1753_vm13, %v1706_v37  ;;  %v551_v56 = vld [vmem:[#allocation2 + $0xe0] sm:$0xff]  ;;  %v1468_v22 = vsel %vm141_vm0, %v2606_v57, %v1095_v38 }
  0xcb   : > { %1300 = vrot.lane.b32.xlu1 %v792_v29, %s2421_s23  ;;  %v570_v0 = vrot.slane %v551_v56, 7  ;;  %v666_v11 = vrot.slane %v551_v56, 1  ;;  %v778_v24 = vpack.c.bf16 %v552_v58, %v551_v56  ;;  %v939_v56 = vrot.slane %v824_v14, 1 }
  0xcc   : > { %v1429_v45 = vpop.permute.xlu0 %1428 }
  0xcd   : > { %v1708_v49 = vsel %vm1700_vm12, %v1675_v43, %v1429_v45  ;;  %v1097_v51 = vpop.permute.xlu1 %1096  ;;  %v618_v4 = vsel %vm315_vm1, %v586_v1, %v570_v0  ;;  %v602_v7 = vsel %vm315_vm1, %v570_v0, %v586_v1  ;;  %v714_v20 = vsel %vm412_vm3, %v682_v13, %v666_v11 }
  0xce   : > { %1346 = vrot.lane.b32.xlu0 %v2848_v5, %s2422_s24  ;;  %2351 = vmatmul.mubr.msk.bf16.gmra.mrb[4].mxu0 %vm1753_vm13, %v1708_v49  ;;  %v647_v9 = vsel %vm247_vm4, %v618_v4, 0.0  ;;  %v744_v30 = vsel %vm250_vm2, %v714_v20, 0.0  ;;  %v1471_v36 = vsel %vm141_vm0, %v2634_v8, %v1097_v51 }
  0xcf   : > { %1348 = vrot.lane.b32.xlu1 %v2887_v42, %s2422_s24  ;;  %v2916_v16 = vpack.c.bf16 %v602_v7, %v647_v9 }
  0xd0   : > { %v1143_v53 = vpop.permute.xlu0 %1142 }
  0xd1   : > { %v1145_v55 = vpop.permute.xlu1 %1144  ;;  %v1512_v23 = vsel %vm1502_vm6, %v1468_v22, %v1143_v53 }
  0xd2   : > { %1394 = vrot.lane.b32.xlu0 %v776_v15, %s2423_s25  ;;  %v1514_v31 = vsel %vm1502_vm6, %v1471_v36, %v1145_v55 }
  0xd3   : > { %1396 = vrot.lane.b32.xlu1 %v1049_v52, %s2423_s25 }
  0xd4   : > { %v1191_v61 = vpop.permute.xlu0 %1190 }
  0xd5   : > { %v1193_v63 = vpop.permute.xlu1 %1192  ;;  %v1545_v25 = vsel %vm1535_vm7, %v1512_v23, %v1191_v61  ;;  %v828_v23 = vld [vmem:[#allocation2 + $0x110] sm:$0xff] }
  0xd6   : > { %1442 = vrot.lane.b32.xlu0 %v792_v29, %s2424_s26  ;;  %v1547_v39 = vsel %vm1535_vm7, %v1514_v31, %v1193_v63 }
  0xd7   : > { %1110 = vrot.lane.b32.xlu1 %v776_v15, %s2417_s15  ;;  %v825_v15 = vld [vmem:[#allocation2 + $0xf8] sm:$0xff] }
  0xd8   : > { %v1239_v44 = vpop.permute.xlu0 %1238  ;;  %v859_v21 = vrot.slane %v825_v15, 7  ;;  %v955_v58 = vrot.slane %v825_v15, 1  ;;  %v1051_v61 = vpack.c.bf16 %v825_v15, %v824_v14 }
  0xd9   : > { %v1241_v47 = vpop.permute.xlu1 %1240  ;;  %v1578_v57 = vsel %vm1568_vm8, %v1545_v25, %v1239_v44  ;;  %v556_v44 = vld [vmem:[#allocation2 + $0x108] sm:$0xff] }
  0xda   : > { %1444 = vrot.lane.b32.xlu0 %v1065_v41, %s2424_s26  ;;  %v891_v35 = vsel %vm315_vm1, %v859_v21, %v843_v18  ;;  %v875_v45 = vsel %vm315_vm1, %v843_v18, %v859_v21  ;;  %v1580_v46 = vsel %vm1568_vm8, %v1547_v39, %v1241_v47  ;;  %v987_v0 = vsel %vm412_vm3, %v955_v58, %v939_v56 }
  0xdb   : > { %1112 = vrot.lane.b32.xlu1 %v1049_v52, %s2417_s15  ;;  %v920_v8 = vsel %vm247_vm4, %v891_v35, 0.0  ;;  %v971_v47 = vsel %vm412_vm3, %v939_v56, %v955_v58  ;;  %v1017_v4 = vsel %vm250_vm2, %v987_v0, 0.0  ;;  %v684_v22 = vrot.slane %v556_v44, 1 }
  0xdc   : > { %v1287_v6 = vpop.permute.xlu0 %1286  ;;  %v2955_v53 = vpack.c.bf16 %v875_v45, %v920_v8 }
  0xdd   : > { %v1289_v10 = vpop.permute.xlu1 %1288  ;;  %v1611_v26 = vsel %vm1601_vm9, %v1578_v57, %v1287_v6  ;;  %v845_v57 = vrot.slane %v828_v23, 7 }
  0xde   : > { %1158 = vrot.lane.b32.xlu0 %v792_v29, %s2418_s16  ;;  %v698_v29 = vsel %vm412_vm3, %v666_v11, %v682_v13  ;;  %v1613_v51 = vsel %vm1601_vm9, %v1580_v46, %v1289_v10  ;;  %v588_v10 = vrot.slane %v556_v44, 7  ;;  %v1067_v11 = vpack.c.bf16 %v1017_v4, %v971_v47 }
  0xdf   : > { %1160 = vrot.lane.b32.xlu1 %v1065_v41, %s2418_s16  ;;  %v794_v38 = vpack.c.bf16 %v744_v30, %v698_v29 }
  0xe0   : > { %v1335_v17 = vpop.permute.xlu0 %1334 }
  0xe1   : > { %v1337_v19 = vpop.permute.xlu1 %1336  ;;  %v1644_v37 = vsel %vm1634_vm10, %v1611_v26, %v1335_v17 }
  0xe2   : > { %1206 = vrot.lane.b32.xlu0 %v2887_v42, %s2420_s22 }
  0xe3   : > { %1208 = vrot.lane.b32.xlu1 %v2916_v16, %s2420_s22 }
  0xe4   : > { %v1383_v27 = vpop.permute.xlu0 %1382 }
  0xe5   : > { %v1385_v32 = vpop.permute.xlu1 %1384  ;;  %v1677_v40 = vsel %vm1667_vm11, %v1644_v37, %v1383_v27 }
  0xe6   : > { %1254 = vrot.lane.b32.xlu0 %v1049_v52, %s2419_s17  ;;  %v1646_v52 = vsel %vm1634_vm10, %v1613_v51, %v1337_v19 }
  0xe7   : > { %1256 = vrot.lane.b32.xlu1 %v778_v24, %s2419_s17  ;;  %v1679_v54 = vsel %vm1667_vm11, %v1646_v52, %v1385_v32 }
  0xe8   : > { %v1431_v43 = vpop.permute.xlu0 %1430 }
  0xe9   : > { %v1710_v48 = vsel %vm1700_vm12, %v1677_v40, %v1431_v43  ;;  %v1099_v49 = vpop.permute.xlu1 %1098 }
  0xea   : > { %1302 = vrot.lane.b32.xlu0 %v1065_v41, %s2421_s23  ;;  %2354 = vmatprep.mubr.msk.bf16.mxu0 %vm1753_vm13, %v1710_v48  ;;  %v555_v41 = vld [vmem:[#allocation2 + $0x100] sm:$0xff]  ;;  %v1474_v35 = vsel %vm141_vm0, %v2664_v34, %v1099_v49 }
  0xeb   : > { %1304 = vrot.lane.b32.xlu1 %v794_v38, %s2421_s23  ;;  %v572_v9 = vrot.slane %v555_v41, 7  ;;  %v668_v21 = vrot.slane %v555_v41, 1  ;;  %v780_v26 = vpack.c.bf16 %v556_v44, %v555_v41 }
  0xec   : > { %v1433_v55 = vpop.permute.xlu0 %1432 }
  0xed   : > { %v1712_v59 = vsel %vm1700_vm12, %v1679_v54, %v1433_v55  ;;  %v1101_v60 = vpop.permute.xlu1 %1100  ;;  %v620_v15 = vsel %vm315_vm1, %v588_v10, %v572_v9  ;;  %v604_v19 = vsel %vm315_vm1, %v572_v9, %v588_v10  ;;  %v716_v30 = vsel %vm412_vm3, %v684_v22, %v668_v21 }
  0xee   : > { %1350 = vrot.lane.b32.xlu0 %v2916_v16, %s2422_s24  ;;  %2355 = vmatmul.mubr.msk.bf16.gmra.mrb[8].mxu0 %vm1753_vm13, %v1712_v59  ;;  %v651_v20 = vsel %vm247_vm4, %v620_v15, 0.0  ;;  %v748_v39 = vsel %vm250_vm2, %v716_v30, 0.0  ;;  %v1477_v45 = vsel %vm141_vm0, %v2688_v50, %v1101_v60  ;;  %v941_v60 = vrot.slane %v828_v23, 1 }
  0xef   : > { %1352 = vrot.lane.b32.xlu1 %v2955_v53, %s2422_s24  ;;  %v764_v25 = vpack.c.bf16 %v604_v19, %v651_v20 }
  0xf0   : > { %v1147_v63 = vpop.permute.xlu0 %1146 }
  0xf1   : > { %v1149_v1 = vpop.permute.xlu1 %1148  ;;  %v1516_v36 = vsel %vm1502_vm6, %v1474_v35, %v1147_v63 }
  0xf2   : > { %1398 = vrot.lane.b32.xlu0 %v778_v24, %s2423_s25  ;;  %v1518_v46 = vsel %vm1502_vm6, %v1477_v45, %v1149_v1 }
  0xf3   : > { %1400 = vrot.lane.b32.xlu1 %v1051_v61, %s2423_s25 }
  0xf4   : > { %v1195_v6 = vpop.permute.xlu0 %1194 }
  0xf5   : > { %v1197_v7 = vpop.permute.xlu1 %1196  ;;  %v1549_v31 = vsel %vm1535_vm7, %v1516_v36, %v1195_v6 }
  0xf6   : > { %1446 = vrot.lane.b32.xlu0 %v794_v38, %s2424_s26  ;;  %v1551_v51 = vsel %vm1535_vm7, %v1518_v46, %v1197_v7 }
  0xf7   : > { %1114 = vrot.lane.b32.xlu1 %v778_v24, %s2417_s15  ;;  %v829_v24 = vld [vmem:[#allocation2 + $0x118] sm:$0xff] }
  0xf8   : > { %v1243_v13 = vpop.permute.xlu0 %1242  ;;  %v861_v32 = vrot.slane %v829_v24, 7  ;;  %v1053_v7 = vpack.c.bf16 %v829_v24, %v828_v23 }
  0xf9   : > { %v1245_v14 = vpop.permute.xlu1 %1244  ;;  %v1582_v40 = vsel %vm1568_vm8, %v1549_v31, %v1243_v13 }
  0xfa   : > { %1448 = vrot.lane.b32.xlu0 %v1067_v11, %s2424_s26  ;;  %v893_v43 = vsel %vm315_vm1, %v861_v32, %v845_v57  ;;  %v877_v55 = vsel %vm315_vm1, %v845_v57, %v861_v32  ;;  %v1584_v56 = vsel %vm1568_vm8, %v1551_v51, %v1245_v14 }
  0xfb   : > { %1116 = vrot.lane.b32.xlu1 %v1051_v61, %s2417_s15  ;;  %v924_v50 = vsel %vm247_vm4, %v893_v43, 0.0 }
  0xfc   : > { %v1291_v17 = vpop.permute.xlu0 %1290  ;;  %v1037_v1 = vpack.c.bf16 %v877_v55, %v924_v50 }
  0xfd   : > { %v1293_v18 = vpop.permute.xlu1 %1292  ;;  %v1615_v8 = vsel %vm1601_vm9, %v1582_v40, %v1291_v17 }
  0xfe   : > { %1162 = vrot.lane.b32.xlu0 %v794_v38, %s2418_s16  ;;  %v700_v38 = vsel %vm412_vm3, %v668_v21, %v684_v22  ;;  %v1617_v63 = vsel %vm1601_vm9, %v1584_v56, %v1293_v18 }
  0xff   : > { %1164 = vrot.lane.b32.xlu1 %v1067_v11, %s2418_s16  ;;  %v796_v49 = vpack.c.bf16 %v748_v39, %v700_v38 }
 0x100   : > { %v1339_v27 = vpop.permute.xlu0 %1338 }
 0x101   : > { %v1341_v29 = vpop.permute.xlu1 %1340  ;;  %v1648_v48 = vsel %vm1634_vm10, %v1615_v8, %v1339_v27 }
 0x102   : > { %1210 = vrot.lane.b32.xlu0 %v2955_v53, %s2420_s22  ;;  %v1650_v0 = vsel %vm1634_vm10, %v1617_v63, %v1341_v29 }
 0x103   : > { %1212 = vrot.lane.b32.xlu1 %v764_v25, %s2420_s22 }
 0x104   : > { %v1387_v37 = vpop.permute.xlu0 %1386 }
 0x105   : > { %v1389_v34 = vpop.permute.xlu1 %1388  ;;  %v1681_v52 = vsel %vm1667_vm11, %v1648_v48, %v1387_v37 }
 0x106   : > { %1258 = vrot.lane.b32.xlu0 %v1051_v61, %s2419_s17  ;;  %v957_v61 = vrot.slane %v829_v24, 1  ;;  %v1683_v41 = vsel %vm1667_vm11, %v1650_v0, %v1389_v34 }
 0x107   : > { %1260 = vrot.lane.b32.xlu1 %v780_v26, %s2419_s17 }
 0x108   : > { %v1435_v54 = vpop.permute.xlu0 %1434  ;;  %v989_v6 = vsel %vm412_vm3, %v957_v61, %v941_v60  ;;  %v973_v10 = vsel %vm412_vm3, %v941_v60, %v957_v61 }
 0x109   : > { %v1714_v58 = vsel %vm1700_vm12, %v1681_v52, %v1435_v54  ;;  %v1103_v59 = vpop.permute.xlu1 %1102 }
 0x10a   : > { %1306 = vrot.lane.b32.xlu0 %v1067_v11, %s2421_s23  ;;  %2358 = vmatprep.mubr.msk.bf16.mxu0 %vm1753_vm13, %v1714_v58  ;;  %v1021_v11 = vsel %vm250_vm2, %v989_v6, 0.0  ;;  %v1480_v3 = vsel %vm141_vm0, %v2717_v12, %v1103_v59 }
 0x10b   : > { %1308 = vrot.lane.b32.xlu1 %v796_v49, %s2421_s23  ;;  %v1069_v14 = vpack.c.bf16 %v1021_v11, %v973_v10 }
 0x10c   : > { %v1437_v44 = vpop.permute.xlu0 %1436 }
 0x10d   : > { %v1716_v47 = vsel %vm1700_vm12, %v1683_v41, %v1437_v44  ;;  %v1105_v4 = vpop.permute.xlu1 %1104 }
 0x10e   : > { %1354 = vrot.lane.b32.xlu0 %v764_v25, %s2422_s24  ;;  %2359 = vmatmul.mubr.msk.bf16.gmra.mrb[12].mxu0 %vm1753_vm13, %v1716_v47  ;;  %v1483_v30 = vsel %vm141_vm0, %v2739_v28, %v1105_v4 }
 0x10f   : > { %1356 = vrot.lane.b32.xlu1 %v1037_v1, %s2422_s24 }
 0x110   : > { %v1151_v9 = vpop.permute.xlu0 %1150 }
 0x111   : > { %v1153_v13 = vpop.permute.xlu1 %1152  ;;  %v1520_v23 = vsel %vm1502_vm6, %v1480_v3, %v1151_v9 }
 0x112   : > { %1402 = vrot.lane.b32.xlu0 %v780_v26, %s2423_s25  ;;  %v1522_v32 = vsel %vm1502_vm6, %v1483_v30, %v1153_v13 }
 0x113   : > { %1404 = vrot.lane.b32.xlu1 %v1053_v7, %s2423_s25 }
 0x114   : > { %v1199_v15 = vpop.permute.xlu0 %1198 }
 0x115   : > { %v1201_v17 = vpop.permute.xlu1 %1200  ;;  %v1553_v24 = vsel %vm1535_vm7, %v1520_v23, %v1199_v15 }
 0x116   : > { %1450 = vrot.lane.b32.xlu0 %v796_v49, %s2424_s26  ;;  %v1555_v36 = vsel %vm1535_vm7, %v1522_v32, %v1201_v17 }
 0x117   : > { %1452 = vrot.lane.b32.xlu1 %v1069_v14, %s2424_s26 }
 0x118   : > { %v1247_v19 = vpop.permute.xlu0 %1246 }
 0x119   : > { %v1249_v20 = vpop.permute.xlu1 %1248  ;;  %v1586_v27 = vsel %vm1568_vm8, %v1553_v24, %v1247_v19 }
 0x11a   : > { %v1588_v31 = vsel %vm1568_vm8, %v1555_v36, %v1249_v20 }
 0x11c   : > { %v1295_v18 = vpop.permute.xlu0 %1294 }
 0x11d   : > { %v1297_v2 = vpop.permute.xlu1 %1296  ;;  %v1619_v57 = vsel %vm1601_vm9, %v1586_v27, %v1295_v18 }
 0x11e   : > { %v1621_v39 = vsel %vm1601_vm9, %v1588_v31, %v1297_v2 }
 0x120   : > { %v1343_v21 = vpop.permute.xlu0 %1342 }
 0x121   : > { %v1345_v22 = vpop.permute.xlu1 %1344  ;;  %v1652_v35 = vsel %vm1634_vm10, %v1619_v57, %v1343_v21 }
 0x122   : > { %v1654_v28 = vsel %vm1634_vm10, %v1621_v39, %v1345_v22 }
 0x124   : > { %v1391_v25 = vpop.permute.xlu0 %1390 }
 0x125   : > { %v1393_v29 = vpop.permute.xlu1 %1392  ;;  %v1685_v12 = vsel %vm1667_vm11, %v1652_v35, %v1391_v25 }
 0x126   : > { %v1687_v40 = vsel %vm1667_vm11, %v1654_v28, %v1393_v29 }
 0x128   : > { %v1439_v26 = vpop.permute.xlu0 %1438 }
 0x129   : > { %v1107_v37 = vpop.permute.xlu1 %1106  ;;  %v1718_v38 = vsel %vm1700_vm12, %v1685_v12, %v1439_v26 }
 0x12a   : > { %2362 = vmatprep.mubr.msk.bf16.mxu1 %vm1753_vm13, %v1718_v38  ;;  %v1486_v58 = vsel %vm141_vm0, %v2775_v62, %v1107_v37 }
 0x12c   : > { %v1441_v34 = vpop.permute.xlu0 %1440 }
 0x12d   : > { %v1720_v43 = vsel %vm1700_vm12, %v1687_v40, %v1441_v34  ;;  %v1109_v45 = vpop.permute.xlu1 %1108 }
 0x12e   : > { %2363 = vmatmul.mubr.msk.bf16.vlgmr.msra.gmra.mrb[0].mxu1 %vm1753_vm13, %v1720_v43  ;;  %v1489_v1 = vsel %vm141_vm0, %v2815_v33, %v1109_v45 }
 0x130   : > { %v1155_v8 = vpop.permute.xlu0 %1154 }
 0x131   : > { %v1157_v46 = vpop.permute.xlu1 %1156  ;;  %v1524_v59 = vsel %vm1502_vm6, %v1486_v58, %v1155_v8 }
 0x132   : > { %v1526_v44 = vsel %vm1502_vm6, %v1489_v1, %v1157_v46 }
 0x134   : > { %v1203_v48 = vpop.permute.xlu0 %1202 }
 0x135   : > { %v1205_v49 = vpop.permute.xlu1 %1204  ;;  %v1557_v60 = vsel %vm1535_vm7, %v1524_v59, %v1203_v48 }
 0x136   : > { %v1559_v4 = vsel %vm1535_vm7, %v1526_v44, %v1205_v49 }
 0x138   : > { %v1251_v51 = vpop.permute.xlu0 %1250 }
 0x139   : > { %v1253_v52 = vpop.permute.xlu1 %1252  ;;  %v1590_v63 = vsel %vm1568_vm8, %v1557_v60, %v1251_v51 }
 0x13a   : > { %v1592_v7 = vsel %vm1568_vm8, %v1559_v4, %v1253_v52 }
 0x13c   : > { %v1299_v54 = vpop.permute.xlu0 %1298 }
 0x13d   : > { %v1301_v55 = vpop.permute.xlu1 %1300  ;;  %v1623_v41 = vsel %vm1601_vm9, %v1590_v63, %v1299_v54 }
 0x13e   : > { %v1625_v11 = vsel %vm1601_vm9, %v1592_v7, %v1301_v55 }
 0x140   : > { %v1347_v50 = vpop.permute.xlu0 %1346 }
 0x141   : > { %v1349_v56 = vpop.permute.xlu1 %1348  ;;  %v1656_v47 = vsel %vm1634_vm10, %v1623_v41, %v1347_v50 }
 0x142   : > { %v1658_v33 = vsel %vm1634_vm10, %v1625_v11, %v1349_v56 }
 0x144   : > { %v1395_v61 = vpop.permute.xlu0 %1394 }
 0x145   : > { %v1397_v0 = vpop.permute.xlu1 %1396  ;;  %v1689_v62 = vsel %vm1667_vm11, %v1656_v47, %v1395_v61 }
 0x146   : > { %v1691_v13 = vsel %vm1667_vm11, %v1658_v33, %v1397_v0 }
 0x148   : > { %v1443_v6 = vpop.permute.xlu0 %1442 }
 0x149   : > { %v1722_v9 = vsel %vm1700_vm12, %v1689_v62, %v1443_v6  ;;  %v1111_v10 = vpop.permute.xlu1 %1110 }
 0x14a   : > { %2366 = vmatprep.mubr.msk.bf16.mxu1 %vm1753_vm13, %v1722_v9  ;;  %v1492_v27 = vsel %vm141_vm0, %v2848_v5, %v1111_v10 }
 0x14c   : > { %v1445_v14 = vpop.permute.xlu0 %1444 }
 0x14d   : > { %v1724_v15 = vsel %vm1700_vm12, %v1691_v13, %v1445_v14  ;;  %v1113_v17 = vpop.permute.xlu1 %1112 }
 0x14e   : > { %2367 = vmatmul.mubr.msk.bf16.gmra.mrb[4].mxu1 %vm1753_vm13, %v1724_v15  ;;  %v1495_v36 = vsel %vm141_vm0, %v2887_v42, %v1113_v17 }
 0x150   : > { %v1159_v19 = vpop.permute.xlu0 %1158 }
 0x151   : > { %v1161_v20 = vpop.permute.xlu1 %1160  ;;  %v1528_v29 = vsel %vm1502_vm6, %v1492_v27, %v1159_v19 }
 0x152   : > { %v1530_v26 = vsel %vm1502_vm6, %v1495_v36, %v1161_v20 }
 0x154   : > { %v1207_v18 = vpop.permute.xlu0 %1206 }
 0x155   : > { %v1209_v2 = vpop.permute.xlu1 %1208  ;;  %v1561_v30 = vsel %vm1535_vm7, %v1528_v29, %v1207_v18 }
 0x156   : > { %v1563_v37 = vsel %vm1535_vm7, %v1530_v26, %v1209_v2 }
 0x158   : > { %v1255_v21 = vpop.permute.xlu0 %1254 }
 0x159   : > { %v1257_v22 = vpop.permute.xlu1 %1256  ;;  %v1594_v32 = vsel %vm1568_vm8, %v1561_v30, %v1255_v21 }
 0x15a   : > { %v1596_v39 = vsel %vm1568_vm8, %v1563_v37, %v1257_v22 }
 0x15c   : > { %v1303_v3 = vpop.permute.xlu0 %1302 }
 0x15d   : > { %v1305_v23 = vpop.permute.xlu1 %1304  ;;  %v1627_v12 = vsel %vm1601_vm9, %v1594_v32, %v1303_v3 }
 0x15e   : > { %v1629_v34 = vsel %vm1601_vm9, %v1596_v39, %v1305_v23 }
 0x160   : > { %v1351_v24 = vpop.permute.xlu0 %1350 }
 0x161   : > { %v1353_v25 = vpop.permute.xlu1 %1352  ;;  %v1660_v31 = vsel %vm1634_vm10, %v1627_v12, %v1351_v24 }
 0x162   : > { %v1662_v42 = vsel %vm1634_vm10, %v1629_v34, %v1353_v25 }
 0x164   : > { %v1399_v57 = vpop.permute.xlu0 %1398 }
 0x165   : > { %v1401_v35 = vpop.permute.xlu1 %1400  ;;  %v1693_v5 = vsel %vm1667_vm11, %v1660_v31, %v1399_v57 }
 0x166   : > { %v1695_v43 = vsel %vm1667_vm11, %v1662_v42, %v1401_v35 }
 0x168   : > { %v1447_v38 = vpop.permute.xlu0 %1446 }
 0x169   : > { %v1726_v28 = vsel %vm1700_vm12, %v1693_v5, %v1447_v38  ;;  %v1115_v40 = vpop.permute.xlu1 %1114 }
 0x16a   : > { %2370 = vmatprep.mubr.msk.bf16.mxu1 %vm1753_vm13, %v1726_v28  ;;  %v1498_v61 = vsel %vm141_vm0, %v2916_v16, %v1115_v40 }
 0x16c   : > { %v1449_v45 = vpop.permute.xlu0 %1448 }
 0x16d   : > { %v1728_v8 = vsel %vm1700_vm12, %v1695_v43, %v1449_v45  ;;  %v1117_v46 = vpop.permute.xlu1 %1116 }
 0x16e   : > { %2371 = vmatmul.mubr.msk.bf16.gmra.mrb[8].mxu1 %vm1753_vm13, %v1728_v8  ;;  %v1501_v0 = vsel %vm141_vm0, %v2955_v53, %v1117_v46 }
 0x170   : > { %v1163_v48 = vpop.permute.xlu0 %1162 }
 0x171   : > { %v1165_v49 = vpop.permute.xlu1 %1164  ;;  %v1532_v1 = vsel %vm1502_vm6, %v1498_v61, %v1163_v48 }
 0x172   : > { %v1534_v44 = vsel %vm1502_vm6, %v1501_v0, %v1165_v49 }
 0x174   : > { %v1211_v51 = vpop.permute.xlu0 %1210 }
 0x175   : > { %v1213_v52 = vpop.permute.xlu1 %1212  ;;  %v1565_v47 = vsel %vm1535_vm7, %v1532_v1, %v1211_v51 }
 0x176   : > { %v1567_v6 = vsel %vm1535_vm7, %v1534_v44, %v1213_v52 }
 0x178   : > { %v1259_v54 = vpop.permute.xlu0 %1258 }
 0x179   : > { %v1261_v55 = vpop.permute.xlu1 %1260  ;;  %v1598_v16 = vsel %vm1568_vm8, %v1565_v47, %v1259_v54 }
 0x17a   : > { %v1600_v10 = vsel %vm1568_vm8, %v1567_v6, %v1261_v55 }
 0x17c   : > { %v1307_v50 = vpop.permute.xlu0 %1306 }
 0x17d   : > { %v1309_v56 = vpop.permute.xlu1 %1308  ;;  %v1631_v11 = vsel %vm1601_vm9, %v1598_v16, %v1307_v50 }
 0x17e   : > { %v1633_v13 = vsel %vm1601_vm9, %v1600_v10, %v1309_v56 }
 0x180   : > { %v1355_v58 = vpop.permute.xlu0 %1354 }
 0x181   : > { %v1357_v59 = vpop.permute.xlu1 %1356  ;;  %v3095_v60 = vpop.f32.mrb[0].mxu0  ;;  %v1664_v14 = vsel %vm1634_vm10, %v1631_v11, %v1355_v58 }
 0x182   : > { %v3099_v63 = vpop.f32.mrb[1].mxu0  ;;  %v1954_v15 = vsel %vm141_vm0, %v3095_v60, 0.0  ;;  %v1666_v17 = vsel %vm1634_vm10, %v1633_v13, %v1357_v59 }
 0x183   : > { %v3104_v41 = vpop.f32.mrb[2].mxu0  ;;  %v1951_v7 = vsel %vm141_vm0, %v3099_v63, 0.0 }
 0x184   : > { %v1403_v4 = vpop.permute.xlu0 %1402  ;;  %v3108_v62 = vpop.f32.mrb[3].mxu0  ;;  %v1956_v2 = vsel %vm141_vm0, %v3104_v41, 0.0 }
 0x185   : > { %v1405_v9 = vpop.permute.xlu1 %1404  ;;  %v1952_v53 = vsel %vm141_vm0, %v3108_v62, 0.0  ;;  %v1697_v19 = vsel %vm1667_vm11, %v1664_v14, %v1403_v4 }
 0x186   : > { %v1953_v33 = vadd.f32 %v1952_v53, %v1951_v7  ;;  %v1699_v21 = vsel %vm1667_vm11, %v1666_v17, %v1405_v9 }
 0x188   : > { %v1955_v20 = vadd.f32 %v1954_v15, %v1953_v33  ;;  %v1451_v18 = vpop.permute.xlu0 %1450 }
 0x189   : > { %v1730_v22 = vsel %vm1700_vm12, %v1697_v19, %v1451_v18  ;;  %v1453_v3 = vpop.permute.xlu1 %1452 }
 0x18a   : > { %v1732_v23 = vsel %vm1700_vm12, %v1699_v21, %v1453_v3  ;;  %2374 = vmatprep.mubr.msk.bf16.mxu1 %vm1753_vm13, %v1730_v22  ;;  %v1957_v24 = vadd.f32 %v1956_v2, %v1955_v20 }
 0x18b   : > { %2375 = vmatmul.mubr.msk.bf16.gmra.mrb[12].mxu1 %vm1753_vm13, %v1732_v23 }
 0x1a1   : > { %v3131_v25 = vpop.f32.mrb[4].mxu0 }
 0x1a2   : > { %v3133_v27 = vpop.f32.mrb[5].mxu0  ;;  %v1962_v12 = vsel %vm141_vm0, %v3131_v25, 0.0 }
 0x1a3   : > { %v1958_v29 = vsel %vm141_vm0, %v3133_v27, 0.0  ;;  %v3137_v30 = vpop.f32.mrb[6].mxu0 }
 0x1a4   : > { %v1959_v57 = vadd.f32 %v1958_v29, %v1957_v24  ;;  %v3139_v32 = vpop.f32.mrb[7].mxu0  ;;  %v1964_v31 = vsel %vm141_vm0, %v3137_v30, 0.0 }
 0x1a5   : > { %v1960_v35 = vsel %vm141_vm0, %v3139_v32, 0.0 }
 0x1a6   : > { %v1961_v36 = vadd.f32 %v1960_v35, %v1959_v57 }
 0x1a8   : > { %v1963_v26 = vadd.f32 %v1962_v12, %v1961_v36 }
 0x1aa   : > { %v1965_v37 = vadd.f32 %v1964_v31, %v1963_v26 }
 0x1c1   : > { %v3147_v5 = vpop.f32.mrb[8].mxu0 }
 0x1c2   : > { %v3149_v38 = vpop.f32.mrb[9].mxu0  ;;  %v1970_v45 = vsel %vm141_vm0, %v3147_v5, 0.0 }
 0x1c3   : > { %v1966_v39 = vsel %vm141_vm0, %v3149_v38, 0.0  ;;  %v3153_v28 = vpop.f32.mrb[10].mxu0 }
 0x1c4   : > { %v1967_v40 = vadd.f32 %v1966_v39, %v1965_v37  ;;  %v3155_v34 = vpop.f32.mrb[11].mxu0  ;;  %v1972_v46 = vsel %vm141_vm0, %v3153_v28, 0.0 }
 0x1c5   : > { %v1968_v42 = vsel %vm141_vm0, %v3155_v34, 0.0 }
 0x1c6   : > { %v1969_v43 = vadd.f32 %v1968_v42, %v1967_v40 }
 0x1c8   : > { %v1971_v8 = vadd.f32 %v1970_v45, %v1969_v43 }
 0x1ca   : > { %v1973_v48 = vadd.f32 %v1972_v46, %v1971_v8 }
 0x1e1   : > { %v3163_v49 = vpop.f32.mrb[12].mxu0 }
 0x1e2   : > { %v3165_v51 = vpop.f32.mrb[13].mxu0  ;;  %v1978_v59 = vsel %vm141_vm0, %v3163_v49, 0.0 }
 0x1e3   : > { %v1974_v52 = vsel %vm141_vm0, %v3165_v51, 0.0  ;;  %v3169_v54 = vpop.f32.mrb[14].mxu0 }
 0x1e4   : > { %v1975_v55 = vadd.f32 %v1974_v52, %v1973_v48  ;;  %v3171_v50 = vpop.f32.mrb[15].mxu0  ;;  %v1980_v0 = vsel %vm141_vm0, %v3169_v54, 0.0 }
 0x1e5   : > { %v1976_v56 = vsel %vm141_vm0, %v3171_v50, 0.0 }
 0x1e6   : > { %v1977_v58 = vadd.f32 %v1976_v56, %v1975_v55 }
 0x1e8   : > { %v1979_v61 = vadd.f32 %v1978_v59, %v1977_v58 }
 0x1ea   : > { %v1981_v1 = vadd.f32 %v1980_v0, %v1979_v61 }
 0x201   : > { %v3179_v44 = vpop.f32.mrb[0].mxu1 }
 0x202   : > { %v3181_v47 = vpop.f32.mrb[1].mxu1  ;;  %v1986_v10 = vsel %vm141_vm0, %v3179_v44, 0.0 }
 0x203   : > { %v1982_v4 = vsel %vm141_vm0, %v3181_v47, 0.0  ;;  %v3185_v6 = vpop.f32.mrb[2].mxu1 }
 0x204   : > { %v1983_v16 = vadd.f32 %v1982_v4, %v1981_v1  ;;  %v3187_v7 = vpop.f32.mrb[3].mxu1  ;;  %v1988_v33 = vsel %vm141_vm0, %v3185_v6, 0.0 }
 0x205   : > { %v1984_v9 = vsel %vm141_vm0, %v3187_v7, 0.0 }
 0x206   : > { %v1985_v53 = vadd.f32 %v1984_v9, %v1983_v16 }
 0x208   : > { %v1987_v11 = vadd.f32 %v1986_v10, %v1985_v53 }
 0x20a   : > { %v1989_v13 = vadd.f32 %v1988_v33, %v1987_v11 }
 0x221   : > { %v3195_v14 = vpop.f32.mrb[4].mxu1 }
 0x222   : > { %v1904_v15 = vpop.f32.mrb[5].mxu1  ;;  %v1994_v22 = vsel %vm141_vm0, %v3195_v14, 0.0 }
 0x223   : > { %v1990_v17 = vsel %vm141_vm0, %v1904_v15, 0.0  ;;  %v3198_v19 = vpop.f32.mrb[6].mxu1 }
 0x224   : > { %v1991_v20 = vadd.f32 %v1990_v17, %v1989_v13  ;;  %v1907_v18 = vpop.f32.mrb[7].mxu1  ;;  %v1996_v23 = vsel %vm141_vm0, %v3198_v19, 0.0 }
 0x225   : > { %v1992_v2 = vsel %vm141_vm0, %v1907_v18, 0.0 }
 0x226   : > { %v1993_v21 = vadd.f32 %v1992_v2, %v1991_v20 }
 0x228   : > { %v1995_v3 = vadd.f32 %v1994_v22, %v1993_v21 }
 0x22a   : > { %v1997_v24 = vadd.f32 %v1996_v23, %v1995_v3 }
 0x241   : > { %v2372_v29 = vpop.f32.mrb[8].mxu1 }
 0x242   : > { %v1920_v57 = vpop.f32.mrb[9].mxu1  ;;  %v2002_v39 = vsel %vm141_vm0, %v2372_v29, 0.0 }
 0x243   : > { %v1998_v35 = vsel %vm141_vm0, %v1920_v57, 0.0  ;;  %v2373_v36 = vpop.f32.mrb[10].mxu1 }
 0x244   : > { %v1999_v12 = vadd.f32 %v1998_v35, %v1997_v24  ;;  %v1923_v26 = vpop.f32.mrb[11].mxu1  ;;  %v2004_v42 = vsel %vm141_vm0, %v2373_v36, 0.0 }
 0x245   : > { %v2000_v31 = vsel %vm141_vm0, %v1923_v26, 0.0 }
 0x246   : > { %v2001_v37 = vadd.f32 %v2000_v31, %v1999_v12 }
 0x248   : > { %v2003_v40 = vadd.f32 %v2002_v39, %v2001_v37 }
 0x24a   : > { %v2005_v43 = vadd.f32 %v2004_v42, %v2003_v40 }
 0x25e   : > { %v2376_v45 = vpop.f32.mrb[12].mxu1 }
 0x25f   : > { %v1936_v8 = vpop.f32.mrb[13].mxu1  ;;  %v2010_v59 = vsel %vm141_vm0, %v2376_v45, 0.0 }
 0x260   : > { %v2006_v46 = vsel %vm141_vm0, %v1936_v8, 0.0  ;;  %v2377_v48 = vpop.f32.mrb[14].mxu1 }
 0x261   : > { %v2007_v52 = vadd.f32 %v2006_v46, %v2005_v43  ;;  %v1939_v55 = vpop.f32.mrb[15].mxu1  ;;  %v2012_v0 = vsel %vm141_vm0, %v2377_v48, 0.0 }
 0x262   : > { %v2008_v56 = vsel %vm141_vm0, %v1939_v55, 0.0 }
 0x263   : > { %v2009_v58 = vadd.f32 %v2008_v56, %v2007_v52 }
 0x265   : > { %v2011_v61 = vadd.f32 %v2010_v59, %v2009_v58 }
 0x267   : > { %v2013_v1 = vadd.f32 %v2012_v0, %v2011_v61 }
 0x269   : > { %v2014_v4 = vrot.slane %v2013_v1, 4 }
 0x26b   : > { %v2015_v16 = vadd.f32 %v2014_v4, %v2013_v1 }
 0x26d   : > { %v2016_v9 = vrot.slane %v2015_v16, 2 }
 0x26f   : > { %v2017_v53 = vadd.f32 %v2016_v9, %v2015_v16 }
 0x271   : > { %v2018_v10 = vrot.slane %v2017_v53, 1 }
 0x273   : > { %v2019_v11 = vadd.f32 %v2018_v10, %v2017_v53 }
 0x275   : > { %v2021_v33 = vmul.f32 0.00390625, %v2019_v11 }
 0x277   : > { %v2022_v13 = vsub.f32 %v3099_v63, %v2021_v33  ;;  %v2023_v17 = vsub.f32 %v3108_v62, %v2021_v33  ;;  %v2024_v20 = vsub.f32 %v3095_v60, %v2021_v33  ;;  %v2025_v2 = vsub.f32 %v3104_v41, %v2021_v33 }
 0x278   : > { %v2026_v21 = vsub.f32 %v3133_v27, %v2021_v33  ;;  %v2027_v22 = vsub.f32 %v3139_v32, %v2021_v33  ;;  %v2028_v3 = vsub.f32 %v3131_v25, %v2021_v33  ;;  %v2029_v23 = vsub.f32 %v3137_v30, %v2021_v33 }
 0x279   : > { %v2030_v24 = vsub.f32 %v3149_v38, %v2021_v33  ;;  %v2031_v35 = vsub.f32 %v3155_v34, %v2021_v33  ;;  %v2032_v63 = vsub.f32 %v3147_v5, %v2021_v33  ;;  %v2033_v62 = vsub.f32 %v3153_v28, %v2021_v33 }
 0x27a   : > { %v2034_v60 = vsub.f32 %v3165_v51, %v2021_v33  ;;  %v2035_v41 = vsub.f32 %v3171_v50, %v2021_v33  ;;  %v2036_v27 = vsub.f32 %v3163_v49, %v2021_v33  ;;  %v2037_v32 = vsub.f32 %v3169_v54, %v2021_v33 }
 0x27b   : > { %v2038_v25 = vsub.f32 %v3181_v47, %v2021_v33  ;;  %v2039_v30 = vsub.f32 %v3187_v7, %v2021_v33  ;;  %v3232_v38 = vsub.f32 %v3179_v44, %v2021_v33  ;;  %v3235_v34 = vsub.f32 %v3185_v6, %v2021_v33 }
 0x27c   : > { %v3237_v5 = vsub.f32 %v1904_v15, %v2021_v33  ;;  %v3239_v28 = vsub.f32 %v1907_v18, %v2021_v33  ;;  %v3242_v51 = vsub.f32 %v3195_v14, %v2021_v33  ;;  %v3245_v49 = vsub.f32 %v3198_v19, %v2021_v33 }
 0x27d   : > { %v3247_v54 = vsub.f32 %v1920_v57, %v2021_v33  ;;  %v3249_v50 = vsub.f32 %v1923_v26, %v2021_v33  ;;  %v3251_v47 = vsub.f32 %v2372_v29, %v2021_v33  ;;  %v3253_v44 = vsub.f32 %v2373_v36, %v2021_v33 }
 0x27e   : > { %v3255_v6 = vsub.f32 %v1936_v8, %v2021_v33  ;;  %v3257_v7 = vsub.f32 %v1939_v55, %v2021_v33  ;;  %v3259_v15 = vsub.f32 %v2376_v45, %v2021_v33  ;;  %v3261_v18 = vsub.f32 %v2377_v48, %v2021_v33 }
 0x27f   : > { %v2054_v14 = vmul.f32 %v2022_v13, %v2022_v13  ;;  %v2055_v12 = vmul.f32 %v2023_v17, %v2023_v17  ;;  %v2056_v19 = vmul.f32 %v2024_v20, %v2024_v20  ;;  %v2057_v31 = vmul.f32 %v2025_v2, %v2025_v2 }
 0x280   : > { %v2058_v37 = vmul.f32 %v2026_v21, %v2026_v21  ;;  %v2059_v40 = vmul.f32 %v2027_v22, %v2027_v22  ;;  %v2060_v45 = vmul.f32 %v2028_v3, %v2028_v3  ;;  %v2061_v48 = vmul.f32 %v2029_v23, %v2029_v23 }
 0x281   : > { %v2086_v57 = vsel %vm141_vm0, %v2054_v14, 0.0  ;;  %v2087_v26 = vsel %vm141_vm0, %v2055_v12, 0.0  ;;  %v2089_v36 = vsel %vm141_vm0, %v2056_v19, 0.0  ;;  %v2091_v42 = vsel %vm141_vm0, %v2057_v31, 0.0 }
 0x282   : > { %v2088_v29 = vadd.f32 %v2087_v26, %v2086_v57  ;;  %v2093_v8 = vsel %vm141_vm0, %v2058_v37, 0.0  ;;  %v2095_v52 = vsel %vm141_vm0, %v2059_v40, 0.0  ;;  %v2062_v56 = vmul.f32 %v2030_v24, %v2030_v24 }
 0x283   : > { %v2097_v58 = vsel %vm141_vm0, %v2060_v45, 0.0  ;;  %v2063_v61 = vmul.f32 %v2031_v35, %v2031_v35  ;;  %v2099_v0 = vsel %vm141_vm0, %v2061_v48, 0.0  ;;  %v2064_v4 = vmul.f32 %v2032_v63, %v2032_v63 }
 0x284   : > { %v2090_v39 = vadd.f32 %v2089_v36, %v2088_v29  ;;  %v2101_v16 = vsel %vm141_vm0, %v2062_v56, 0.0  ;;  %v2065_v53 = vmul.f32 %v2033_v62, %v2033_v62  ;;  %v2066_v33 = vmul.f32 %v2034_v60, %v2034_v60 }
 0x285   : > { %v2103_v10 = vsel %vm141_vm0, %v2063_v61, 0.0  ;;  %v2105_v13 = vsel %vm141_vm0, %v2064_v4, 0.0  ;;  %v2067_v20 = vmul.f32 %v2035_v41, %v2035_v41  ;;  %v2068_v22 = vmul.f32 %v2036_v27, %v2036_v27 }
 0x286   : > { %v2092_v43 = vadd.f32 %v2091_v42, %v2090_v39  ;;  %v2107_v2 = vsel %vm141_vm0, %v2065_v53, 0.0  ;;  %v2109_v3 = vsel %vm141_vm0, %v2066_v33, 0.0  ;;  %v2069_v24 = vmul.f32 %v2037_v32, %v2037_v32 }
 0x287   : > { %v2111_v35 = vsel %vm141_vm0, %v2067_v20, 0.0  ;;  %v2070_v62 = vmul.f32 %v2038_v25, %v2038_v25  ;;  %v2113_v14 = vsel %vm141_vm0, %v2068_v22, 0.0  ;;  %v2071_v60 = vmul.f32 %v2039_v30, %v2039_v30 }
 0x288   : > { %v2094_v46 = vadd.f32 %v2093_v8, %v2092_v43  ;;  %v2115_v19 = vsel %vm141_vm0, %v2069_v24, 0.0  ;;  %v2072_v41 = vmul.f32 %v3232_v38, %v3232_v38  ;;  %v2073_v32 = vmul.f32 %v3235_v34, %v3235_v34 }
 0x289   : > { %v2117_v27 = vsel %vm141_vm0, %v2070_v62, 0.0  ;;  %v2119_v26 = vsel %vm141_vm0, %v2071_v60, 0.0  ;;  %v2074_v25 = vmul.f32 %v3237_v5, %v3237_v5  ;;  %v2075_v36 = vmul.f32 %v3239_v28, %v3239_v28 }
 0x28a   : > { %v2096_v55 = vadd.f32 %v2095_v52, %v2094_v46  ;;  %v2121_v30 = vsel %vm141_vm0, %v2072_v41, 0.0  ;;  %v2123_v38 = vsel %vm141_vm0, %v2073_v32, 0.0  ;;  %v2076_v40 = vmul.f32 %v3242_v51, %v3242_v51 }
 0x28b   : > { %v2125_v34 = vsel %vm141_vm0, %v2074_v25, 0.0  ;;  %v2077_v43 = vmul.f32 %v3245_v49, %v3245_v49  ;;  %v2127_v5 = vsel %vm141_vm0, %v2075_v36, 0.0  ;;  %v2078_v8 = vmul.f32 %v3247_v54, %v3247_v54 }
 0x28c   : > { %v2098_v59 = vadd.f32 %v2097_v58, %v2096_v55  ;;  %v2129_v28 = vsel %vm141_vm0, %v2076_v40, 0.0  ;;  %v2079_v48 = vmul.f32 %v3249_v50, %v3249_v50  ;;  %v2080_v55 = vmul.f32 %v3251_v47, %v3251_v47 }
 0x28d   : > { %v2131_v51 = vsel %vm141_vm0, %v2077_v43, 0.0  ;;  %v2133_v49 = vsel %vm141_vm0, %v2078_v8, 0.0  ;;  %v2081_v58 = vmul.f32 %v3253_v44, %v3253_v44  ;;  %v2082_v61 = vmul.f32 %v3255_v6, %v3255_v6 }
 0x28e   : > { %v2100_v1 = vadd.f32 %v2099_v0, %v2098_v59  ;;  %v2135_v54 = vsel %vm141_vm0, %v2079_v48, 0.0  ;;  %v2137_v50 = vsel %vm141_vm0, %v2080_v55, 0.0  ;;  %v2085_v53 = vmul.f32 %v3261_v18, %v3261_v18 }
 0x28f   : > { %v2139_v47 = vsel %vm141_vm0, %v2081_v58, 0.0  ;;  %v2141_v44 = vsel %vm141_vm0, %v2082_v61, 0.0 }
 0x290   : > { %v2102_v9 = vadd.f32 %v2101_v16, %v2100_v1  ;;  %v2083_v1 = vmul.f32 %v3257_v7, %v3257_v7  ;;  %v2084_v16 = vmul.f32 %v3259_v15, %v3259_v15  ;;  %v2147_v7 = vsel %vm141_vm0, %v2085_v53, 0.0 }
 0x292   : > { %v2104_v11 = vadd.f32 %v2103_v10, %v2102_v9  ;;  %v2143_v6 = vsel %vm141_vm0, %v2083_v1, 0.0 }
 0x294   : > { %v2106_v17 = vadd.f32 %v2105_v13, %v2104_v11  ;;  %v2145_v11 = vsel %vm141_vm0, %v2084_v16, 0.0 }
 0x296   : > { %v2108_v21 = vadd.f32 %v2107_v2, %v2106_v17 }
 0x298   : > { %v2110_v23 = vadd.f32 %v2109_v3, %v2108_v21 }
 0x29a   : > { %v2112_v63 = vadd.f32 %v2111_v35, %v2110_v23 }
 0x29c   : > { %v2114_v12 = vadd.f32 %v2113_v14, %v2112_v63 }
 0x29e   : > { %v2116_v31 = vadd.f32 %v2115_v19, %v2114_v12 }
 0x2a0   : > { %v2118_v57 = vadd.f32 %v2117_v27, %v2116_v31 }
 0x2a2   : > { %v2120_v29 = vadd.f32 %v2119_v26, %v2118_v57 }
 0x2a4   : > { %v2122_v37 = vadd.f32 %v2121_v30, %v2120_v29 }
 0x2a6   : > { %v2124_v39 = vadd.f32 %v2123_v38, %v2122_v37 }
 0x2a8   : > { %v2126_v42 = vadd.f32 %v2125_v34, %v2124_v39 }
 0x2aa   : > { %v2128_v45 = vadd.f32 %v2127_v5, %v2126_v42 }
 0x2ac   : > { %v2130_v46 = vadd.f32 %v2129_v28, %v2128_v45 }
 0x2ae   : > { %v2132_v52 = vadd.f32 %v2131_v51, %v2130_v46 }
 0x2b0   : > { %v2134_v56 = vadd.f32 %v2133_v49, %v2132_v52 }
 0x2b2   : > { %v2136_v59 = vadd.f32 %v2135_v54, %v2134_v56 }
 0x2b4   : > { %v2138_v0 = vadd.f32 %v2137_v50, %v2136_v59 }
 0x2b6   : > { %v2140_v4 = vadd.f32 %v2139_v47, %v2138_v0 }
 0x2b8   : > { %v2142_v9 = vadd.f32 %v2141_v44, %v2140_v4 }
 0x2ba   : > { %v2144_v10 = vadd.f32 %v2143_v6, %v2142_v9 }
 0x2bc   : > { %v2146_v33 = vadd.f32 %v2145_v11, %v2144_v10 }
 0x2be   : > { %v2148_v13 = vadd.f32 %v2147_v7, %v2146_v33 }
 0x2c0   : > { %v2149_v17 = vrot.slane %v2148_v13, 4 }
 0x2c2   : > { %v2150_v20 = vadd.f32 %v2149_v17, %v2148_v13 }
 0x2c4   : > { %v2151_v2 = vrot.slane %v2150_v20, 2 }
 0x2c6   : > { %v2152_v15 = vadd.f32 %v2151_v2, %v2150_v20 }
 0x2c8   : > { %v2153_v21 = vrot.slane %v2152_v15, 1 }
 0x2ca   : > { %v2154_v22 = vadd.f32 %v2153_v21, %v2152_v15 }
 0x2cc   : > { %v2156_v3 = vmul.f32 0.003921569, %v2154_v22 }
 0x2ce   : > { %2406 = vrsqrt.f32 %v2156_v3  ;;  %vm2159_vm14 = vcmp.eq.f32.partialorder %v2156_v3, inf  ;;  %v2162_v24 = vand.u32 2147483648, %v2156_v3  ;;  %vm2161_vm0 = vcmp.eq.f32.partialorder %v2156_v3, 0.0 }
 0x2d8   : > { %v2407_v23 = vpop.eup %2406 }
 0x2d9   : > { %v2158_v18 = vmul.f32 %v2407_v23, %v2156_v3 }
 0x2db   : > { %v2160_v35 = vsel %vm2159_vm14, %v2156_v3, %v2158_v18 }
 0x2dc   : > { %v2163_v63 = vsel %vm2161_vm0, %v2162_v24, %v2160_v35 }
 0x2dd   : > { %2165 = vst.msk [vmem:[%s139_s3] sm:$0x1] %vm2164_vm15, %v2163_v63 }
 0x2de PF: > { %s12_s9 = sadd.s32 1, %s2414_s9  }
 0x2df   : > { %p9_p4 = scmp.ge.s32.totalorder %s12_s9, 4  }
 0x2e1   :  { %11 = sbr.rel (!%p9_p4) target bundleno = 1 (0x1), region = 61 }

</bundles_post_ra>
